<compile_context>
chip_gen: v7x
topology: tpu7x:2x2x1
jax: 0.10.0
libtpu: 0.0.40
codegen_flags: <defaults>
</compile_context>

<pallas_src>
import functools

import jax
import jax.numpy as jnp
from jax import lax
from jax.experimental import pallas as pl
from jax.experimental.pallas import tpu as pltpu


def _full_attn_kernel(q_ref, k_ref, v_ref, bias_ref, wqkv_ref, wp_ref, bp_ref,
                      o_ref, *, batch_block, num_heads, head_dim, nq, nk,
                      compute_dtype, fuse_qkv, packed_out, single_out_proj):
    f32 = jnp.float32
    cdt = compute_dtype
    dim = num_heads * head_dim
    out_dim = wp_ref.shape[1]
    rq, rk = batch_block * nq, batch_block * nk

    wqkv = wqkv_ref[...]                       # (dim, 3*dim); scale folded into Wq cols
    wp = wp_ref[...]                           # (dim, out_dim)
    bp = bp_ref[...].astype(f32)               # (1, out_dim)

    q_blk = q_ref[...].astype(cdt)             # (rq, dim)
    k_blk = k_ref[...].astype(cdt)             # (rk, dim)
    v_blk = v_ref[...].astype(cdt)             # (rk, dim)

    # ---- projections: one fused MXU matmul when 3*dim <= 128 (never worse on a
    #      128-wide MXU; one weight latch instead of three), else three dots. ----
    if fuse_qkv:
        x_cat = jnp.concatenate([q_blk, k_blk, v_blk], axis=0)          # sublane concat
        qkv = jnp.dot(x_cat, wqkv, preferred_element_type=f32).astype(cdt)
        q_all = qkv[:rq]                       # (rq, 3*dim); per-head cols sliced below
        k_all = qkv[rq:rq + rk]
        v_all = qkv[rq + rk:]
        q_col0, k_col0, v_col0 = 0, dim, 2 * dim
    else:
        q_all = jnp.dot(q_blk, wqkv[:, :dim], preferred_element_type=f32).astype(cdt)
        k_all = jnp.dot(k_blk, wqkv[:, dim:2 * dim], preferred_element_type=f32).astype(cdt)
        v_all = jnp.dot(v_blk, wqkv[:, 2 * dim:], preferred_element_type=f32).astype(cdt)
        q_col0 = k_col0 = v_col0 = 0

    # ---- per-head lane slices, hoisted OUT of the batch loop (3*H total). ----
    def col(a, c0, h):
        return a[:, c0 + h * head_dim: c0 + (h + 1) * head_dim]

    q_heads = [col(q_all, q_col0, h) for h in range(num_heads)]          # (rq, hd)
    k_heads = [col(k_all, k_col0, h) for h in range(num_heads)]          # (rk, hd)
    v_heads = [col(v_all, v_col0, h) for h in range(num_heads)]          # (rk, hd)
    wp_heads = None
    if not single_out_proj:
        wp_heads = [wp[h * head_dim:(h + 1) * head_dim, :] for h in range(num_heads)]

    dn = (((1,), (1,)), ((), ()))              # q_h @ k_h^T without a transpose

    for b in range(batch_block):
        qs = slice(b * nq, (b + 1) * nq)       # sublane row slices (cheap)
        ks = slice(b * nk, (b + 1) * nk)
        bias_b = bias_ref[b].astype(f32)       # (nq, nk), loaded once per batch element

        ctx_heads = []
        acc = None
        for h in range(num_heads):
            qh = q_heads[h][qs]                # (nq, hd)
            kh = k_heads[h][ks]                # (nk, hd)
            vh = v_heads[h][ks]                # (nk, hd)
            s = lax.dot_general(qh, kh, dn, preferred_element_type=f32)  # (nq, nk)
            s = s + bias_b
            s = s - jnp.max(s, axis=-1, keepdims=True)
            e = jnp.exp(s)
            denom = jnp.sum(e, axis=-1, keepdims=True)
            # Deferred normalization: scale the (nq, hd) context, not the (nq, nk)
            # probabilities; the reciprocal runs on the EUP slot.
            oh = jnp.dot(e.astype(cdt), vh, preferred_element_type=f32)  # (nq, hd)
            oh = oh * pl.reciprocal(denom, approx=True)
            if single_out_proj:
                ctx_heads.append(oh)
            else:
                # Head-accumulated output projection: dot -> add, nothing in between.
                part = jnp.dot(oh.astype(cdt), wp_heads[h], preferred_element_type=f32)
                acc = part if acc is None else acc + part

        if single_out_proj:
            ctx = jnp.concatenate(ctx_heads, axis=-1)                    # (nq, dim)
            acc = jnp.dot(ctx.astype(cdt), wp, preferred_element_type=f32)

        out_b = (acc + bp).astype(o_ref.dtype)                           # (nq, out_dim)
        if packed_out:
            # Lane-dense writeback: one unmasked, 128-aligned lane-range store per b.
            lo = b * nq * out_dim
            o_ref[:, :, lo:lo + nq * out_dim] = out_b.reshape(1, 1, nq * out_dim)
        else:
            o_ref[b * nq:(b + 1) * nq, :] = out_b


def _tpu_vmem_capacity_bytes(default=128 * 1024 * 1024):
    try:
        cap = int(pltpu.get_tpu_info().vmem_capacity_bytes)
        return max(cap, 64 * 1024 * 1024)
    except Exception:
        return default


def _step_vmem_bytes(bb, nq, nk, dim, out_dim, in_bytes, cdt_bytes, out_bytes):
    rq, rk = bb * nq, bb * nk
    # Double-buffered activation / bias / output blocks.
    stream = 2 * ((rq + 2 * rk) * dim * in_bytes
                  + bb * nq * nk * cdt_bytes
                  + rq * out_dim * out_bytes)
    weights = 2 * (dim * 3 * dim + dim * out_dim + out_dim) * cdt_bytes
    # Rough in-kernel f32 intermediates (projected qkv, one score tile, accumulator).
    interm = ((rq + 2 * rk) * 3 * dim + 2 * nq * nk + rq * out_dim) * 4
    return stream + weights + interm


def _pick_batch_block(B, nq, nk, dim, out_dim, in_bytes, cdt_bytes, out_bytes, *,
                      vmem_budget, target_rows, min_grid_steps, max_block=8):
    def legal(bb):
        if B % bb:
            return False
        if bb != B and ((bb * nq) % 8 or (bb * nk) % 8):
            return False          # blocks smaller than the array need 8-aligned rows
        return True

    def fits(bb):
        return _step_vmem_bytes(bb, nq, nk, dim, out_dim,
                                in_bytes, cdt_bytes, out_bytes) <= vmem_budget

    start = max(1, min(B, max_block, max(1, target_rows // max(nq, 1))))
    for bb in range(start, 0, -1):
        if legal(bb) and fits(bb) and (B // bb >= min_grid_steps or bb == 1):
            return bb
    return 1 if legal(1) else B    # full-extent blocks are always (8,128)-legal


def full_attn_pallas(query, key, value, att_bias, params, *, num_heads,
                     batch_block=None, compute_dtype=None):
    """GPViT FullAttnModule forward (inference; attn_drop = proj_drop = 0).

    Weights are pre-transposed to (in_features, out_features).  Passing
    compute_dtype=jnp.bfloat16 halves weight/activation/bias DMA bytes and is a
    good default on ALL TPU generations (v5e included) — the MXU is bf16-native
    and all softmax / accumulation math stays in f32 inside the kernel.
    """
    B, nq, dim = query.shape
    _, nk, _ = key.shape
    assert dim % num_heads == 0, "dim must be divisible by num_heads"
    head_dim = dim // num_heads
    scale = head_dim ** -0.5
    out_dim = params["wp"].shape[1]

    cdt = jnp.dtype(compute_dtype) if compute_dtype is not None else query.dtype
    out_dtype = query.dtype

    # Generation-aware VMEM budget: ~48 MiB on 64 MiB (v7x-class) chips,
    # ~96 MiB on 128 MiB (v5e/v6e) chips.  <=64 MiB VMEM is also used as the
    # proxy for "2 TensorCores per chip" -> keep >= 2 parallel grid steps.
    cap = _tpu_vmem_capacity_bytes()
    vmem_limit = int(0.75 * cap)
    min_grid_steps = 2 if cap <= 64 * 1024 * 1024 else 1
    target_rows = 256 if cap <= 64 * 1024 * 1024 else 512

    if batch_block is None:
        bb = _pick_batch_block(
            B, nq, nk, dim, out_dim,
            jnp.dtype(query.dtype).itemsize, jnp.dtype(cdt).itemsize,
            jnp.dtype(out_dtype).itemsize,
            vmem_budget=vmem_limit, target_rows=target_rows,
            min_grid_steps=min_grid_steps)
    else:
        bb = batch_block
    assert B % bb == 0, "batch_block must divide batch size"
    assert bb == B or ((bb * nq) % 8 == 0 and (bb * nk) % 8 == 0), (
        "blocks smaller than the array need sublane-aligned (x8) row counts")
    grid = (B // bb,)

    # Free row-major collapses so the kernel sees lane/sublane-dense 2-D slabs.
    q2 = query.reshape(B * nq, dim)
    k2 = key.reshape(B * nk, dim)
    v2 = value.reshape(B * nk, dim)
    bias_c = att_bias.astype(cdt)      # bf16 path halves the largest activation DMA

    # Fused [Wq*scale | Wk | Wv]: one weight DMA stream; softmax scale folded in.
    wqkv = jnp.concatenate(
        [params["wq"] * scale, params["wk"], params["wv"]], axis=1).astype(cdt)
    wp = params["wp"].astype(cdt)
    bp = params["bp"].astype(jnp.float32).reshape(1, out_dim)

    fuse_qkv = (3 * dim <= 128) and ((bb * nq) % 8 == 0) and ((bb * nk) % 8 == 0)
    packed_out = (out_dim % 128 != 0) and ((nq * out_dim) % 128 == 0)
    single_out_proj = (head_dim >= 32) or (num_heads >= 8)

    base_kernel = functools.partial(
        _full_attn_kernel, batch_block=bb, num_heads=num_heads, head_dim=head_dim,
        nq=nq, nk=nk, compute_dtype=cdt, fuse_qkv=fuse_qkv,
        single_out_proj=single_out_proj)

    def build(use_packed_out, single_buffer_weights):
        # Constant-index weight/bias blocks never change -> single-buffer them.
        wmode = dict(pipeline_mode=pl.Buffered(1)) if single_buffer_weights else {}
        in_specs = [
            pl.BlockSpec((bb * nq, dim), lambda b: (b, 0)),            # query rows
            pl.BlockSpec((bb * nk, dim), lambda b: (b, 0)),            # key rows
            pl.BlockSpec((bb * nk, dim), lambda b: (b, 0)),            # value rows
            pl.BlockSpec((bb, nq, nk), lambda b: (b, 0, 0)),           # att_bias
            pl.BlockSpec((dim, 3 * dim), lambda b: (0, 0), **wmode),   # [Wq*s|Wk|Wv]
            pl.BlockSpec((dim, out_dim), lambda b: (0, 0), **wmode),   # WpT
            pl.BlockSpec((1, out_dim), lambda b: (0, 0), **wmode),     # proj bias
        ]
        if use_packed_out:
            out_shape = jax.ShapeDtypeStruct((B // bb, 1, bb * nq * out_dim), out_dtype)
            out_spec = pl.BlockSpec((1, 1, bb * nq * out_dim), lambda b: (b, 0, 0))
        else:
            out_shape = jax.ShapeDtypeStruct((B * nq, out_dim), out_dtype)
            out_spec = pl.BlockSpec((bb * nq, out_dim), lambda b: (b, 0))
        return pl.pallas_call(
            functools.partial(base_kernel, packed_out=use_packed_out),
            out_shape=out_shape,
            grid_spec=pltpu.PrefetchScalarGridSpec(
                num_scalar_prefetch=0, grid=grid,
                in_specs=in_specs, out_specs=out_spec),
            compiler_params=pltpu.CompilerParams(
                dimension_semantics=("parallel",),
                vmem_limit_bytes=vmem_limit),
        )

    args = (q2, k2, v2, bias_c, wqkv, wp, bp)
    try:
        out = jax.block_until_ready(build(packed_out, True)(*args))
    except Exception:
        # pipeline_mode=Buffered(1) and the lane-packed output store are the only
        # features whose Mosaic lowering varies across JAX versions; everything
        # else below uses the same op vocabulary as the known-good v1 kernel.
        out = jax.block_until_ready(build(False, False)(*args))

    return out.reshape(B, nq, out_dim)


def full_attn_reference(query, key, value, att_bias, params, *, num_heads):
    # Pure-JAX reference mirroring the PyTorch forward (dropout p=0).
    B, nq, dim = query.shape
    head_dim = dim // num_heads
    scale = head_dim ** -0.5
    q = query @ params["wq"]
    k = key @ params["wk"]
    v = value @ params["wv"]
    nk = k.shape[1]
    qh = q.reshape(B, nq, num_heads, head_dim).transpose(0, 2, 1, 3)
    kh = k.reshape(B, nk, num_heads, head_dim).transpose(0, 2, 1, 3)
    vh = v.reshape(B, nk, num_heads, head_dim).transpose(0, 2, 1, 3)
    attn = jnp.einsum("bhqd,bhkd->bhqk", qh, kh) * scale
    attn = attn + att_bias[:, None, :, :]
    attn = jax.nn.softmax(attn, axis=-1)
    o = jnp.einsum("bhqk,bhkd->bhqd", attn, vh)
    o = o.transpose(0, 2, 1, 3).reshape(B, nq, dim)
    return o @ params["wp"] + params["bp"]


def _make_inputs(key0, B, NQ, NK, DIM, OUT_DIM):
    ks = jax.random.split(key0, 9)
    query = jax.random.normal(ks[0], (B, NQ, DIM), dtype=jnp.float32)
    kkey = jax.random.normal(ks[1], (B, NK, DIM), dtype=jnp.float32)
    value = jax.random.normal(ks[2], (B, NK, DIM), dtype=jnp.float32)
    att_bias = 0.1 * jax.random.normal(ks[3], (B, NQ, NK), dtype=jnp.float32)
    # Pre-transposed weights: (in_features, out_features). qkv_bias=False.
    params = {
        "wq": 0.05 * jax.random.normal(ks[4], (DIM, DIM), dtype=jnp.float32),
        "wk": 0.05 * jax.random.normal(ks[5], (DIM, DIM), dtype=jnp.float32),
        "wv": 0.05 * jax.random.normal(ks[6], (DIM, DIM), dtype=jnp.float32),
        "wp": 0.05 * jax.random.normal(ks[7], (DIM, OUT_DIM), dtype=jnp.float32),
        "bp": 0.01 * jax.random.normal(ks[8], (1, OUT_DIM), dtype=jnp.float32),
    }
    return query, kkey, value, att_bias, params


if __name__ == "__main__":
    # Shapes consistent with FullAttnModule(dim=32, num_heads=4), out_dim=None.
    DIM, HEADS, OUT_DIM = 32, 4, 32
    key0 = jax.random.PRNGKey(0)

    # --- Check 1: f32 compute, auto batch_block (VMEM / generation aware),
    #     exercises the fused-QKV + lane-dense packed output path.
    B, NQ, NK = 2, 8, 16
    query, kkey, value, att_bias, params = _make_inputs(key0, B, NQ, NK, DIM, OUT_DIM)
    out = full_attn_pallas(query, kkey, value, att_bias, params, num_heads=HEADS)
    out = jax.block_until_ready(out)
    ref = full_attn_reference(query, kkey, value, att_bias, params, num_heads=HEADS)
    assert out.shape == (B, NQ, OUT_DIM)
    err = jnp.max(jnp.abs(out - ref))
    assert jnp.allclose(out, ref, atol=2e-3, rtol=2e-3), f"f32 max err {err}"

    # --- Check 2: bf16 MXU compute path (good on v5e/v6e/v7x), explicit
    #     batch_block=2 -> 2 grid steps + multi-batch blocks per step.
    B2 = 4
    q_in, k_in, v_in, ab2, p2 = _make_inputs(
        jax.random.PRNGKey(0), B2, NQ, NK, DIM, OUT_DIM)
    out_bf16 = full_attn_pallas(q_in, k_in, v_in, ab2, p2, num_heads=HEADS,
                                batch_block=2, compute_dtype=jnp.bfloat16)
    out_bf16 = jax.block_until_ready(out_bf16)
    ref2 = full_attn_reference(q_in, k_in, v_in, ab2, p2, num_heads=HEADS)
    assert out_bf16.shape == (B2, NQ, OUT_DIM)
    err2 = jnp.max(jnp.abs(out_bf16 - ref2))
    assert jnp.allclose(out_bf16, ref2, atol=5e-2, rtol=5e-2), f"bf16 max err {err2}"

    print("KERNEL_OK")
</pallas_src>

<mosaic_0001>
module attributes {stable_mosaic.version = 11 : i64} {
  func.func @_full_attn_kernel(%arg0: i32, %arg1: memref<16x32xf32, #tpu.memory_space<vmem>>, %arg2: memref<32x32xf32, #tpu.memory_space<vmem>>, %arg3: memref<32x32xf32, #tpu.memory_space<vmem>>, %arg4: memref<2x8x16xf32, #tpu.memory_space<vmem>>, %arg5: memref<32x96xf32, #tpu.memory_space<vmem>>, %arg6: memref<32x32xf32, #tpu.memory_space<vmem>>, %arg7: memref<1x32xf32, #tpu.memory_space<vmem>>, %arg8: memref<1x1x512xf32, #tpu.memory_space<vmem>>) attributes {dimension_semantics = [#tpu.dimension_semantics<parallel>], iteration_bounds = array<i64: 1>, scalar_prefetch = 0 : i64, scratch_operands = 0 : i64, tpu.core_type = #tpu.core_type<tc>, window_params = [{transform_indices = @transform_0, window_bounds = array<i64: 16, 32>}, {transform_indices = @transform_1, window_bounds = array<i64: 32, 32>}, {transform_indices = @transform_2, window_bounds = array<i64: 32, 32>}, {transform_indices = @transform_3, window_bounds = array<i64: 2, 8, 16>}, {pipeline_mode = #tpu.pipeline_mode<synchronous>, transform_indices = @transform_4, window_bounds = array<i64: 32, 96>}, {pipeline_mode = #tpu.pipeline_mode<synchronous>, transform_indices = @transform_5, window_bounds = array<i64: 32, 32>}, {pipeline_mode = #tpu.pipeline_mode<synchronous>, transform_indices = @transform_6, window_bounds = array<i64: 1, 32>}, {transform_indices = @transform_7, window_bounds = array<i64: 1, 1, 512>}]} {
    %c0 = arith.constant 0 : index
    %c0_0 = arith.constant 0 : index
    %0 = vector.load %arg5[%c0, %c0_0] : memref<32x96xf32, #tpu.memory_space<vmem>>, vector<32x96xf32>
    %c0_1 = arith.constant 0 : index
    %c0_2 = arith.constant 0 : index
    %1 = vector.load %arg6[%c0_1, %c0_2] : memref<32x32xf32, #tpu.memory_space<vmem>>, vector<32x32xf32>
    %c0_3 = arith.constant 0 : index
    %c0_4 = arith.constant 0 : index
    %2 = vector.load %arg7[%c0_3, %c0_4] : memref<1x32xf32, #tpu.memory_space<vmem>>, vector<1x32xf32>
    %c0_5 = arith.constant 0 : index
    %c0_6 = arith.constant 0 : index
    %3 = vector.load %arg1[%c0_5, %c0_6] : memref<16x32xf32, #tpu.memory_space<vmem>>, vector<16x32xf32>
    %c0_7 = arith.constant 0 : index
    %c0_8 = arith.constant 0 : index
    %4 = vector.load %arg2[%c0_7, %c0_8] : memref<32x32xf32, #tpu.memory_space<vmem>>, vector<32x32xf32>
    %c0_9 = arith.constant 0 : index
    %c0_10 = arith.constant 0 : index
    %5 = vector.load %arg3[%c0_9, %c0_10] : memref<32x32xf32, #tpu.memory_space<vmem>>, vector<32x32xf32>
    %6 = tpu.concatenate %3, %4, %5 in 0 : vector<16x32xf32>, vector<32x32xf32>, vector<32x32xf32> -> vector<80x32xf32>
    %cst = arith.constant dense<0.000000e+00> : vector<80x96xf32>
    %7 = tpu.matmul %6, %0, %cst {dimension_numbers = #tpu.dot_dimension_numbers<[1], [0], [0], [1], [0, 0, 1, 1], [], []>} : vector<80x32xf32>, vector<32x96xf32>, vector<80x96xf32> -> vector<80x96xf32>
    %8 = vector.extract_strided_slice %7 {offsets = [0, 0], sizes = [16, 96], strides = [1, 1]} : vector<80x96xf32> to vector<16x96xf32>
    %9 = vector.extract_strided_slice %7 {offsets = [16, 0], sizes = [32, 96], strides = [1, 1]} : vector<80x96xf32> to vector<32x96xf32>
    %10 = vector.extract_strided_slice %7 {offsets = [48, 0], sizes = [32, 96], strides = [1, 1]} : vector<80x96xf32> to vector<32x96xf32>
    %11 = vector.extract_strided_slice %8 {offsets = [0, 0], sizes = [16, 8], strides = [1, 1]} : vector<16x96xf32> to vector<16x8xf32>
    %12 = vector.extract_strided_slice %8 {offsets = [0, 8], sizes = [16, 8], strides = [1, 1]} : vector<16x96xf32> to vector<16x8xf32>
    %13 = vector.extract_strided_slice %8 {offsets = [0, 16], sizes = [16, 8], strides = [1, 1]} : vector<16x96xf32> to vector<16x8xf32>
    %14 = vector.extract_strided_slice %8 {offsets = [0, 24], sizes = [16, 8], strides = [1, 1]} : vector<16x96xf32> to vector<16x8xf32>
    %15 = vector.extract_strided_slice %9 {offsets = [0, 32], sizes = [32, 8], strides = [1, 1]} : vector<32x96xf32> to vector<32x8xf32>
    %16 = vector.extract_strided_slice %9 {offsets = [0, 40], sizes = [32, 8], strides = [1, 1]} : vector<32x96xf32> to vector<32x8xf32>
    %17 = vector.extract_strided_slice %9 {offsets = [0, 48], sizes = [32, 8], strides = [1, 1]} : vector<32x96xf32> to vector<32x8xf32>
    %18 = vector.extract_strided_slice %9 {offsets = [0, 56], sizes = [32, 8], strides = [1, 1]} : vector<32x96xf32> to vector<32x8xf32>
    %19 = vector.extract_strided_slice %10 {offsets = [0, 64], sizes = [32, 8], strides = [1, 1]} : vector<32x96xf32> to vector<32x8xf32>
    %20 = vector.extract_strided_slice %10 {offsets = [0, 72], sizes = [32, 8], strides = [1, 1]} : vector<32x96xf32> to vector<32x8xf32>
    %21 = vector.extract_strided_slice %10 {offsets = [0, 80], sizes = [32, 8], strides = [1, 1]} : vector<32x96xf32> to vector<32x8xf32>
    %22 = vector.extract_strided_slice %10 {offsets = [0, 88], sizes = [32, 8], strides = [1, 1]} : vector<32x96xf32> to vector<32x8xf32>
    %23 = vector.extract_strided_slice %1 {offsets = [0, 0], sizes = [8, 32], strides = [1, 1]} : vector<32x32xf32> to vector<8x32xf32>
    %24 = vector.extract_strided_slice %1 {offsets = [8, 0], sizes = [8, 32], strides = [1, 1]} : vector<32x32xf32> to vector<8x32xf32>
    %25 = vector.extract_strided_slice %1 {offsets = [16, 0], sizes = [8, 32], strides = [1, 1]} : vector<32x32xf32> to vector<8x32xf32>
    %26 = vector.extract_strided_slice %1 {offsets = [24, 0], sizes = [8, 32], strides = [1, 1]} : vector<32x32xf32> to vector<8x32xf32>
    %c0_11 = arith.constant 0 : index
    %c0_12 = arith.constant 0 : index
    %c0_13 = arith.constant 0 : index
    %27 = vector.load %arg4[%c0_11, %c0_12, %c0_13] : memref<2x8x16xf32, #tpu.memory_space<vmem>>, vector<1x8x16xf32>
    %28 = vector.shape_cast %27 : vector<1x8x16xf32> to vector<8x16xf32>
    %29 = vector.extract_strided_slice %11 {offsets = [0, 0], sizes = [8, 8], strides = [1, 1]} : vector<16x8xf32> to vector<8x8xf32>
    %30 = vector.extract_strided_slice %15 {offsets = [0, 0], sizes = [16, 8], strides = [1, 1]} : vector<32x8xf32> to vector<16x8xf32>
    %31 = vector.extract_strided_slice %19 {offsets = [0, 0], sizes = [16, 8], strides = [1, 1]} : vector<32x8xf32> to vector<16x8xf32>
    %cst_14 = arith.constant dense<0.000000e+00> : vector<8x16xf32>
    %32 = tpu.matmul %29, %30, %cst_14 {dimension_numbers = #tpu.dot_dimension_numbers<[1], [1], [0], [0], [0, 0, 1, 0], [], []>} : vector<8x8xf32>, vector<16x8xf32>, vector<8x16xf32> -> vector<8x16xf32>
    %33 = arith.addf %32, %28 : vector<8x16xf32>
    %cst_15 = arith.constant dense<0xFF800000> : vector<8xf32>
    %34 = vector.multi_reduction <maximumf>, %33, %cst_15 [1] : vector<8x16xf32> to vector<8xf32>
    %35 = vector.shape_cast %34 : vector<8xf32> to vector<8x1xf32>
    %36 = vector.broadcast %35 : vector<8x1xf32> to vector<8x16xf32>
    %37 = arith.subf %33, %36 : vector<8x16xf32>
    %38 = math.exp %37 : vector<8x16xf32>
    %cst_16 = arith.constant dense<0.000000e+00> : vector<8xf32>
    %39 = vector.multi_reduction <add>, %38, %cst_16 [1] : vector<8x16xf32> to vector<8xf32>
    %40 = vector.shape_cast %39 : vector<8xf32> to vector<8x1xf32>
    %cst_17 = arith.constant dense<0.000000e+00> : vector<8x8xf32>
    %41 = tpu.matmul %38, %31, %cst_17 {dimension_numbers = #tpu.dot_dimension_numbers<[1], [0], [0], [1], [0, 0, 1, 1], [], []>} : vector<8x16xf32>, vector<16x8xf32>, vector<8x8xf32> -> vector<8x8xf32>
    %42 = tpu.reciprocal %40 {approx = true} : vector<8x1xf32> -> vector<8x1xf32>
    %43 = vector.broadcast %42 : vector<8x1xf32> to vector<8x8xf32>
    %44 = arith.mulf %41, %43 : vector<8x8xf32>
    %cst_18 = arith.constant dense<0.000000e+00> : vector<8x32xf32>
    %45 = tpu.matmul %44, %23, %cst_18 {dimension_numbers = #tpu.dot_dimension_numbers<[1], [0], [0], [1], [0, 0, 1, 1], [], []>} : vector<8x8xf32>, vector<8x32xf32>, vector<8x32xf32> -> vector<8x32xf32>
    %46 = vector.extract_strided_slice %12 {offsets = [0, 0], sizes = [8, 8], strides = [1, 1]} : vector<16x8xf32> to vector<8x8xf32>
    %47 = vector.extract_strided_slice %16 {offsets = [0, 0], sizes = [16, 8], strides = [1, 1]} : vector<32x8xf32> to vector<16x8xf32>
    %48 = vector.extract_strided_slice %20 {offsets = [0, 0], sizes = [16, 8], strides = [1, 1]} : vector<32x8xf32> to vector<16x8xf32>
    %cst_19 = arith.constant dense<0.000000e+00> : vector<8x16xf32>
    %49 = tpu.matmul %46, %47, %cst_19 {dimension_numbers = #tpu.dot_dimension_numbers<[1], [1], [0], [0], [0, 0, 1, 0], [], []>} : vector<8x8xf32>, vector<16x8xf32>, vector<8x16xf32> -> vector<8x16xf32>
    %50 = arith.addf %49, %28 : vector<8x16xf32>
    %cst_20 = arith.constant dense<0xFF800000> : vector<8xf32>
    %51 = vector.multi_reduction <maximumf>, %50, %cst_20 [1] : vector<8x16xf32> to vector<8xf32>
    %52 = vector.shape_cast %51 : vector<8xf32> to vector<8x1xf32>
    %53 = vector.broadcast %52 : vector<8x1xf32> to vector<8x16xf32>
    %54 = arith.subf %50, %53 : vector<8x16xf32>
    %55 = math.exp %54 : vector<8x16xf32>
    %cst_21 = arith.constant dense<0.000000e+00> : vector<8xf32>
    %56 = vector.multi_reduction <add>, %55, %cst_21 [1] : vector<8x16xf32> to vector<8xf32>
    %57 = vector.shape_cast %56 : vector<8xf32> to vector<8x1xf32>
    %cst_22 = arith.constant dense<0.000000e+00> : vector<8x8xf32>
    %58 = tpu.matmul %55, %48, %cst_22 {dimension_numbers = #tpu.dot_dimension_numbers<[1], [0], [0], [1], [0, 0, 1, 1], [], []>} : vector<8x16xf32>, vector<16x8xf32>, vector<8x8xf32> -> vector<8x8xf32>
    %59 = tpu.reciprocal %57 {approx = true} : vector<8x1xf32> -> vector<8x1xf32>
    %60 = vector.broadcast %59 : vector<8x1xf32> to vector<8x8xf32>
    %61 = arith.mulf %58, %60 : vector<8x8xf32>
    %cst_23 = arith.constant dense<0.000000e+00> : vector<8x32xf32>
    %62 = tpu.matmul %61, %24, %cst_23 {dimension_numbers = #tpu.dot_dimension_numbers<[1], [0], [0], [1], [0, 0, 1, 1], [], []>} : vector<8x8xf32>, vector<8x32xf32>, vector<8x32xf32> -> vector<8x32xf32>
    %63 = arith.addf %45, %62 : vector<8x32xf32>
    %64 = vector.extract_strided_slice %13 {offsets = [0, 0], sizes = [8, 8], strides = [1, 1]} : vector<16x8xf32> to vector<8x8xf32>
    %65 = vector.extract_strided_slice %17 {offsets = [0, 0], sizes = [16, 8], strides = [1, 1]} : vector<32x8xf32> to vector<16x8xf32>
    %66 = vector.extract_strided_slice %21 {offsets = [0, 0], sizes = [16, 8], strides = [1, 1]} : vector<32x8xf32> to vector<16x8xf32>
    %cst_24 = arith.constant dense<0.000000e+00> : vector<8x16xf32>
    %67 = tpu.matmul %64, %65, %cst_24 {dimension_numbers = #tpu.dot_dimension_numbers<[1], [1], [0], [0], [0, 0, 1, 0], [], []>} : vector<8x8xf32>, vector<16x8xf32>, vector<8x16xf32> -> vector<8x16xf32>
    %68 = arith.addf %67, %28 : vector<8x16xf32>
    %cst_25 = arith.constant dense<0xFF800000> : vector<8xf32>
    %69 = vector.multi_reduction <maximumf>, %68, %cst_25 [1] : vector<8x16xf32> to vector<8xf32>
    %70 = vector.shape_cast %69 : vector<8xf32> to vector<8x1xf32>
    %71 = vector.broadcast %70 : vector<8x1xf32> to vector<8x16xf32>
    %72 = arith.subf %68, %71 : vector<8x16xf32>
    %73 = math.exp %72 : vector<8x16xf32>
    %cst_26 = arith.constant dense<0.000000e+00> : vector<8xf32>
    %74 = vector.multi_reduction <add>, %73, %cst_26 [1] : vector<8x16xf32> to vector<8xf32>
    %75 = vector.shape_cast %74 : vector<8xf32> to vector<8x1xf32>
    %cst_27 = arith.constant dense<0.000000e+00> : vector<8x8xf32>
    %76 = tpu.matmul %73, %66, %cst_27 {dimension_numbers = #tpu.dot_dimension_numbers<[1], [0], [0], [1], [0, 0, 1, 1], [], []>} : vector<8x16xf32>, vector<16x8xf32>, vector<8x8xf32> -> vector<8x8xf32>
    %77 = tpu.reciprocal %75 {approx = true} : vector<8x1xf32> -> vector<8x1xf32>
    %78 = vector.broadcast %77 : vector<8x1xf32> to vector<8x8xf32>
    %79 = arith.mulf %76, %78 : vector<8x8xf32>
    %cst_28 = arith.constant dense<0.000000e+00> : vector<8x32xf32>
    %80 = tpu.matmul %79, %25, %cst_28 {dimension_numbers = #tpu.dot_dimension_numbers<[1], [0], [0], [1], [0, 0, 1, 1], [], []>} : vector<8x8xf32>, vector<8x32xf32>, vector<8x32xf32> -> vector<8x32xf32>
    %81 = arith.addf %63, %80 : vector<8x32xf32>
    %82 = vector.extract_strided_slice %14 {offsets = [0, 0], sizes = [8, 8], strides = [1, 1]} : vector<16x8xf32> to vector<8x8xf32>
    %83 = vector.extract_strided_slice %18 {offsets = [0, 0], sizes = [16, 8], strides = [1, 1]} : vector<32x8xf32> to vector<16x8xf32>
    %84 = vector.extract_strided_slice %22 {offsets = [0, 0], sizes = [16, 8], strides = [1, 1]} : vector<32x8xf32> to vector<16x8xf32>
    %cst_29 = arith.constant dense<0.000000e+00> : vector<8x16xf32>
    %85 = tpu.matmul %82, %83, %cst_29 {dimension_numbers = #tpu.dot_dimension_numbers<[1], [1], [0], [0], [0, 0, 1, 0], [], []>} : vector<8x8xf32>, vector<16x8xf32>, vector<8x16xf32> -> vector<8x16xf32>
    %86 = arith.addf %85, %28 : vector<8x16xf32>
    %cst_30 = arith.constant dense<0xFF800000> : vector<8xf32>
    %87 = vector.multi_reduction <maximumf>, %86, %cst_30 [1] : vector<8x16xf32> to vector<8xf32>
    %88 = vector.shape_cast %87 : vector<8xf32> to vector<8x1xf32>
    %89 = vector.broadcast %88 : vector<8x1xf32> to vector<8x16xf32>
    %90 = arith.subf %86, %89 : vector<8x16xf32>
    %91 = math.exp %90 : vector<8x16xf32>
    %cst_31 = arith.constant dense<0.000000e+00> : vector<8xf32>
    %92 = vector.multi_reduction <add>, %91, %cst_31 [1] : vector<8x16xf32> to vector<8xf32>
    %93 = vector.shape_cast %92 : vector<8xf32> to vector<8x1xf32>
    %cst_32 = arith.constant dense<0.000000e+00> : vector<8x8xf32>
    %94 = tpu.matmul %91, %84, %cst_32 {dimension_numbers = #tpu.dot_dimension_numbers<[1], [0], [0], [1], [0, 0, 1, 1], [], []>} : vector<8x16xf32>, vector<16x8xf32>, vector<8x8xf32> -> vector<8x8xf32>
    %95 = tpu.reciprocal %93 {approx = true} : vector<8x1xf32> -> vector<8x1xf32>
    %96 = vector.broadcast %95 : vector<8x1xf32> to vector<8x8xf32>
    %97 = arith.mulf %94, %96 : vector<8x8xf32>
    %cst_33 = arith.constant dense<0.000000e+00> : vector<8x32xf32>
    %98 = tpu.matmul %97, %26, %cst_33 {dimension_numbers = #tpu.dot_dimension_numbers<[1], [0], [0], [1], [0, 0, 1, 1], [], []>} : vector<8x8xf32>, vector<8x32xf32>, vector<8x32xf32> -> vector<8x32xf32>
    %99 = arith.addf %81, %98 : vector<8x32xf32>
    %100 = vector.broadcast %2 : vector<1x32xf32> to vector<8x32xf32>
    %101 = arith.addf %99, %100 : vector<8x32xf32>
    %102 = vector.shape_cast %101 : vector<8x32xf32> to vector<1x1x256xf32>
    %c0_34 = arith.constant 0 : index
    %c0_35 = arith.constant 0 : index
    %c0_36 = arith.constant 0 : index
    %103 = vector.load %arg8[%c0_34, %c0_35, %c0_36] : memref<1x1x512xf32, #tpu.memory_space<vmem>>, vector<1x1x256xf32>
    tpu.vector_store %arg8[%c0_34, %c0_35, %c0_36], %102 {strides = array<i32>} : memref<1x1x512xf32, #tpu.memory_space<vmem>>, vector<1x1x256xf32>,
    %c1 = arith.constant 1 : index
    %c0_37 = arith.constant 0 : index
    %c0_38 = arith.constant 0 : index
    %104 = vector.load %arg4[%c1, %c0_37, %c0_38] : memref<2x8x16xf32, #tpu.memory_space<vmem>>, vector<1x8x16xf32>
    %105 = vector.shape_cast %104 : vector<1x8x16xf32> to vector<8x16xf32>
    %106 = vector.extract_strided_slice %11 {offsets = [8, 0], sizes = [8, 8], strides = [1, 1]} : vector<16x8xf32> to vector<8x8xf32>
    %107 = vector.extract_strided_slice %15 {offsets = [16, 0], sizes = [16, 8], strides = [1, 1]} : vector<32x8xf32> to vector<16x8xf32>
    %108 = vector.extract_strided_slice %19 {offsets = [16, 0], sizes = [16, 8], strides = [1, 1]} : vector<32x8xf32> to vector<16x8xf32>
    %cst_39 = arith.constant dense<0.000000e+00> : vector<8x16xf32>
    %109 = tpu.matmul %106, %107, %cst_39 {dimension_numbers = #tpu.dot_dimension_numbers<[1], [1], [0], [0], [0, 0, 1, 0], [], []>} : vector<8x8xf32>, vector<16x8xf32>, vector<8x16xf32> -> vector<8x16xf32>
    %110 = arith.addf %109, %105 : vector<8x16xf32>
    %cst_40 = arith.constant dense<0xFF800000> : vector<8xf32>
    %111 = vector.multi_reduction <maximumf>, %110, %cst_40 [1] : vector<8x16xf32> to vector<8xf32>
    %112 = vector.shape_cast %111 : vector<8xf32> to vector<8x1xf32>
    %113 = vector.broadcast %112 : vector<8x1xf32> to vector<8x16xf32>
    %114 = arith.subf %110, %113 : vector<8x16xf32>
    %115 = math.exp %114 : vector<8x16xf32>
    %cst_41 = arith.constant dense<0.000000e+00> : vector<8xf32>
    %116 = vector.multi_reduction <add>, %115, %cst_41 [1] : vector<8x16xf32> to vector<8xf32>
    %117 = vector.shape_cast %116 : vector<8xf32> to vector<8x1xf32>
    %cst_42 = arith.constant dense<0.000000e+00> : vector<8x8xf32>
    %118 = tpu.matmul %115, %108, %cst_42 {dimension_numbers = #tpu.dot_dimension_numbers<[1], [0], [0], [1], [0, 0, 1, 1], [], []>} : vector<8x16xf32>, vector<16x8xf32>, vector<8x8xf32> -> vector<8x8xf32>
    %119 = tpu.reciprocal %117 {approx = true} : vector<8x1xf32> -> vector<8x1xf32>
    %120 = vector.broadcast %119 : vector<8x1xf32> to vector<8x8xf32>
    %121 = arith.mulf %118, %120 : vector<8x8xf32>
    %cst_43 = arith.constant dense<0.000000e+00> : vector<8x32xf32>
    %122 = tpu.matmul %121, %23, %cst_43 {dimension_numbers = #tpu.dot_dimension_numbers<[1], [0], [0], [1], [0, 0, 1, 1], [], []>} : vector<8x8xf32>, vector<8x32xf32>, vector<8x32xf32> -> vector<8x32xf32>
    %123 = vector.extract_strided_slice %12 {offsets = [8, 0], sizes = [8, 8], strides = [1, 1]} : vector<16x8xf32> to vector<8x8xf32>
    %124 = vector.extract_strided_slice %16 {offsets = [16, 0], sizes = [16, 8], strides = [1, 1]} : vector<32x8xf32> to vector<16x8xf32>
    %125 = vector.extract_strided_slice %20 {offsets = [16, 0], sizes = [16, 8], strides = [1, 1]} : vector<32x8xf32> to vector<16x8xf32>
    %cst_44 = arith.constant dense<0.000000e+00> : vector<8x16xf32>
    %126 = tpu.matmul %123, %124, %cst_44 {dimension_numbers = #tpu.dot_dimension_numbers<[1], [1], [0], [0], [0, 0, 1, 0], [], []>} : vector<8x8xf32>, vector<16x8xf32>, vector<8x16xf32> -> vector<8x16xf32>
    %127 = arith.addf %126, %105 : vector<8x16xf32>
    %cst_45 = arith.constant dense<0xFF800000> : vector<8xf32>
    %128 = vector.multi_reduction <maximumf>, %127, %cst_45 [1] : vector<8x16xf32> to vector<8xf32>
    %129 = vector.shape_cast %128 : vector<8xf32> to vector<8x1xf32>
    %130 = vector.broadcast %129 : vector<8x1xf32> to vector<8x16xf32>
    %131 = arith.subf %127, %130 : vector<8x16xf32>
    %132 = math.exp %131 : vector<8x16xf32>
    %cst_46 = arith.constant dense<0.000000e+00> : vector<8xf32>
    %133 = vector.multi_reduction <add>, %132, %cst_46 [1] : vector<8x16xf32> to vector<8xf32>
    %134 = vector.shape_cast %133 : vector<8xf32> to vector<8x1xf32>
    %cst_47 = arith.constant dense<0.000000e+00> : vector<8x8xf32>
    %135 = tpu.matmul %132, %125, %cst_47 {dimension_numbers = #tpu.dot_dimension_numbers<[1], [0], [0], [1], [0, 0, 1, 1], [], []>} : vector<8x16xf32>, vector<16x8xf32>, vector<8x8xf32> -> vector<8x8xf32>
    %136 = tpu.reciprocal %134 {approx = true} : vector<8x1xf32> -> vector<8x1xf32>
    %137 = vector.broadcast %136 : vector<8x1xf32> to vector<8x8xf32>
    %138 = arith.mulf %135, %137 : vector<8x8xf32>
    %cst_48 = arith.constant dense<0.000000e+00> : vector<8x32xf32>
    %139 = tpu.matmul %138, %24, %cst_48 {dimension_numbers = #tpu.dot_dimension_numbers<[1], [0], [0], [1], [0, 0, 1, 1], [], []>} : vector<8x8xf32>, vector<8x32xf32>, vector<8x32xf32> -> vector<8x32xf32>
    %140 = arith.addf %122, %139 : vector<8x32xf32>
    %141 = vector.extract_strided_slice %13 {offsets = [8, 0], sizes = [8, 8], strides = [1, 1]} : vector<16x8xf32> to vector<8x8xf32>
    %142 = vector.extract_strided_slice %17 {offsets = [16, 0], sizes = [16, 8], strides = [1, 1]} : vector<32x8xf32> to vector<16x8xf32>
    %143 = vector.extract_strided_slice %21 {offsets = [16, 0], sizes = [16, 8], strides = [1, 1]} : vector<32x8xf32> to vector<16x8xf32>
    %cst_49 = arith.constant dense<0.000000e+00> : vector<8x16xf32>
    %144 = tpu.matmul %141, %142, %cst_49 {dimension_numbers = #tpu.dot_dimension_numbers<[1], [1], [0], [0], [0, 0, 1, 0], [], []>} : vector<8x8xf32>, vector<16x8xf32>, vector<8x16xf32> -> vector<8x16xf32>
    %145 = arith.addf %144, %105 : vector<8x16xf32>
    %cst_50 = arith.constant dense<0xFF800000> : vector<8xf32>
    %146 = vector.multi_reduction <maximumf>, %145, %cst_50 [1] : vector<8x16xf32> to vector<8xf32>
    %147 = vector.shape_cast %146 : vector<8xf32> to vector<8x1xf32>
    %148 = vector.broadcast %147 : vector<8x1xf32> to vector<8x16xf32>
    %149 = arith.subf %145, %148 : vector<8x16xf32>
    %150 = math.exp %149 : vector<8x16xf32>
    %cst_51 = arith.constant dense<0.000000e+00> : vector<8xf32>
    %151 = vector.multi_reduction <add>, %150, %cst_51 [1] : vector<8x16xf32> to vector<8xf32>
    %152 = vector.shape_cast %151 : vector<8xf32> to vector<8x1xf32>
    %cst_52 = arith.constant dense<0.000000e+00> : vector<8x8xf32>
    %153 = tpu.matmul %150, %143, %cst_52 {dimension_numbers = #tpu.dot_dimension_numbers<[1], [0], [0], [1], [0, 0, 1, 1], [], []>} : vector<8x16xf32>, vector<16x8xf32>, vector<8x8xf32> -> vector<8x8xf32>
    %154 = tpu.reciprocal %152 {approx = true} : vector<8x1xf32> -> vector<8x1xf32>
    %155 = vector.broadcast %154 : vector<8x1xf32> to vector<8x8xf32>
    %156 = arith.mulf %153, %155 : vector<8x8xf32>
    %cst_53 = arith.constant dense<0.000000e+00> : vector<8x32xf32>
    %157 = tpu.matmul %156, %25, %cst_53 {dimension_numbers = #tpu.dot_dimension_numbers<[1], [0], [0], [1], [0, 0, 1, 1], [], []>} : vector<8x8xf32>, vector<8x32xf32>, vector<8x32xf32> -> vector<8x32xf32>
    %158 = arith.addf %140, %157 : vector<8x32xf32>
    %159 = vector.extract_strided_slice %14 {offsets = [8, 0], sizes = [8, 8], strides = [1, 1]} : vector<16x8xf32> to vector<8x8xf32>
    %160 = vector.extract_strided_slice %18 {offsets = [16, 0], sizes = [16, 8], strides = [1, 1]} : vector<32x8xf32> to vector<16x8xf32>
    %161 = vector.extract_strided_slice %22 {offsets = [16, 0], sizes = [16, 8], strides = [1, 1]} : vector<32x8xf32> to vector<16x8xf32>
    %cst_54 = arith.constant dense<0.000000e+00> : vector<8x16xf32>
    %162 = tpu.matmul %159, %160, %cst_54 {dimension_numbers = #tpu.dot_dimension_numbers<[1], [1], [0], [0], [0, 0, 1, 0], [], []>} : vector<8x8xf32>, vector<16x8xf32>, vector<8x16xf32> -> vector<8x16xf32>
    %163 = arith.addf %162, %105 : vector<8x16xf32>
    %cst_55 = arith.constant dense<0xFF800000> : vector<8xf32>
    %164 = vector.multi_reduction <maximumf>, %163, %cst_55 [1] : vector<8x16xf32> to vector<8xf32>
    %165 = vector.shape_cast %164 : vector<8xf32> to vector<8x1xf32>
    %166 = vector.broadcast %165 : vector<8x1xf32> to vector<8x16xf32>
    %167 = arith.subf %163, %166 : vector<8x16xf32>
    %168 = math.exp %167 : vector<8x16xf32>
    %cst_56 = arith.constant dense<0.000000e+00> : vector<8xf32>
    %169 = vector.multi_reduction <add>, %168, %cst_56 [1] : vector<8x16xf32> to vector<8xf32>
    %170 = vector.shape_cast %169 : vector<8xf32> to vector<8x1xf32>
    %cst_57 = arith.constant dense<0.000000e+00> : vector<8x8xf32>
    %171 = tpu.matmul %168, %161, %cst_57 {dimension_numbers = #tpu.dot_dimension_numbers<[1], [0], [0], [1], [0, 0, 1, 1], [], []>} : vector<8x16xf32>, vector<16x8xf32>, vector<8x8xf32> -> vector<8x8xf32>
    %172 = tpu.reciprocal %170 {approx = true} : vector<8x1xf32> -> vector<8x1xf32>
    %173 = vector.broadcast %172 : vector<8x1xf32> to vector<8x8xf32>
    %174 = arith.mulf %171, %173 : vector<8x8xf32>
    %cst_58 = arith.constant dense<0.000000e+00> : vector<8x32xf32>
    %175 = tpu.matmul %174, %26, %cst_58 {dimension_numbers = #tpu.dot_dimension_numbers<[1], [0], [0], [1], [0, 0, 1, 1], [], []>} : vector<8x8xf32>, vector<8x32xf32>, vector<8x32xf32> -> vector<8x32xf32>
    %176 = arith.addf %158, %175 : vector<8x32xf32>
    %177 = vector.broadcast %2 : vector<1x32xf32> to vector<8x32xf32>
    %178 = arith.addf %176, %177 : vector<8x32xf32>
    %179 = vector.shape_cast %178 : vector<8x32xf32> to vector<1x1x256xf32>
    %c0_59 = arith.constant 0 : index
    %c0_60 = arith.constant 0 : index
    %c256 = arith.constant 256 : index
    %180 = vector.load %arg8[%c0_59, %c0_60, %c256] : memref<1x1x512xf32, #tpu.memory_space<vmem>>, vector<1x1x256xf32>
    tpu.vector_store %arg8[%c0_59, %c0_60, %c256], %179 {strides = array<i32>} : memref<1x1x512xf32, #tpu.memory_space<vmem>>, vector<1x1x256xf32>,
    return
  }
  func.func @transform_0(%arg0: i32) -> (i32, i32) {
    %c0_i32 = arith.constant 0 : i32
    %c0_i32_0 = arith.constant 0 : i32
    return %arg0, %c0_i32 : i32, i32
  }
  func.func @transform_1(%arg0: i32) -> (i32, i32) {
    %c0_i32 = arith.constant 0 : i32
    %c0_i32_0 = arith.constant 0 : i32
    return %arg0, %c0_i32 : i32, i32
  }
  func.func @transform_2(%arg0: i32) -> (i32, i32) {
    %c0_i32 = arith.constant 0 : i32
    %c0_i32_0 = arith.constant 0 : i32
    return %arg0, %c0_i32 : i32, i32
  }
  func.func @transform_3(%arg0: i32) -> (i32, i32, i32) {
    %c0_i32 = arith.constant 0 : i32
    %c0_i32_0 = arith.constant 0 : i32
    %c0_i32_1 = arith.constant 0 : i32
    return %arg0, %c0_i32, %c0_i32_0 : i32, i32, i32
  }
  func.func @transform_4(%arg0: i32) -> (i32, i32) {
    %c0_i32 = arith.constant 0 : i32
    %c0_i32_0 = arith.constant 0 : i32
    %c0_i32_1 = arith.constant 0 : i32
    return %c0_i32, %c0_i32_0 : i32, i32
  }
  func.func @transform_5(%arg0: i32) -> (i32, i32) {
    %c0_i32 = arith.constant 0 : i32
    %c0_i32_0 = arith.constant 0 : i32
    %c0_i32_1 = arith.constant 0 : i32
    return %c0_i32, %c0_i32_0 : i32, i32
  }
  func.func @transform_6(%arg0: i32) -> (i32, i32) {
    %c0_i32 = arith.constant 0 : i32
    %c0_i32_0 = arith.constant 0 : i32
    %c0_i32_1 = arith.constant 0 : i32
    return %c0_i32, %c0_i32_0 : i32, i32
  }
  func.func @transform_7(%arg0: i32) -> (i32, i32, i32) {
    %c0_i32 = arith.constant 0 : i32
    %c0_i32_0 = arith.constant 0 : i32
    %c0_i32_1 = arith.constant 0 : i32
    return %arg0, %c0_i32, %c0_i32_0 : i32, i32, i32
  }
}

module attributes {stable_mosaic.version = 11 : i64} {
  func.func @_full_attn_kernel(%arg0: i32, %arg1: memref<16x32xf32, #tpu.memory_space<vmem>>, %arg2: memref<32x32xf32, #tpu.memory_space<vmem>>, %arg3: memref<32x32xf32, #tpu.memory_space<vmem>>, %arg4: memref<2x8x16xf32, #tpu.memory_space<vmem>>, %arg5: memref<32x96xf32, #tpu.memory_space<vmem>>, %arg6: memref<32x32xf32, #tpu.memory_space<vmem>>, %arg7: memref<1x32xf32, #tpu.memory_space<vmem>>, %arg8: memref<16x32xf32, #tpu.memory_space<vmem>>) attributes {dimension_semantics = [#tpu.dimension_semantics<parallel>], iteration_bounds = array<i64: 1>, scalar_prefetch = 0 : i64, scratch_operands = 0 : i64, tpu.core_type = #tpu.core_type<tc>, window_params = [{transform_indices = @transform_0, window_bounds = array<i64: 16, 32>}, {transform_indices = @transform_1, window_bounds = array<i64: 32, 32>}, {transform_indices = @transform_2, window_bounds = array<i64: 32, 32>}, {transform_indices = @transform_3, window_bounds = array<i64: 2, 8, 16>}, {pipeline_mode = #tpu.pipeline_mode<synchronous>, transform_indices = @transform_4, window_bounds = array<i64: 32, 96>}, {pipeline_mode = #tpu.pipeline_mode<synchronous>, transform_indices = @transform_5, window_bounds = array<i64: 32, 32>}, {pipeline_mode = #tpu.pipeline_mode<synchronous>, transform_indices = @transform_6, window_bounds = array<i64: 1, 32>}, {transform_indices = @transform_7, window_bounds = array<i64: 16, 32>}]} {
    %c0 = arith.constant 0 : index
    %c0_0 = arith.constant 0 : index
    %0 = vector.load %arg5[%c0, %c0_0] : memref<32x96xf32, #tpu.memory_space<vmem>>, vector<32x96xf32>
    %c0_1 = arith.constant 0 : index
    %c0_2 = arith.constant 0 : index
    %1 = vector.load %arg6[%c0_1, %c0_2] : memref<32x32xf32, #tpu.memory_space<vmem>>, vector<32x32xf32>
    %c0_3 = arith.constant 0 : index
    %c0_4 = arith.constant 0 : index
    %2 = vector.load %arg7[%c0_3, %c0_4] : memref<1x32xf32, #tpu.memory_space<vmem>>, vector<1x32xf32>
    %c0_5 = arith.constant 0 : index
    %c0_6 = arith.constant 0 : index
    %3 = vector.load %arg1[%c0_5, %c0_6] : memref<16x32xf32, #tpu.memory_space<vmem>>, vector<16x32xf32>
    %c0_7 = arith.constant 0 : index
    %c0_8 = arith.constant 0 : index
    %4 = vector.load %arg2[%c0_7, %c0_8] : memref<32x32xf32, #tpu.memory_space<vmem>>, vector<32x32xf32>
    %c0_9 = arith.constant 0 : index
    %c0_10 = arith.constant 0 : index
    %5 = vector.load %arg3[%c0_9, %c0_10] : memref<32x32xf32, #tpu.memory_space<vmem>>, vector<32x32xf32>
    %6 = tpu.concatenate %3, %4, %5 in 0 : vector<16x32xf32>, vector<32x32xf32>, vector<32x32xf32> -> vector<80x32xf32>
    %cst = arith.constant dense<0.000000e+00> : vector<80x96xf32>
    %7 = tpu.matmul %6, %0, %cst {dimension_numbers = #tpu.dot_dimension_numbers<[1], [0], [0], [1], [0, 0, 1, 1], [], []>} : vector<80x32xf32>, vector<32x96xf32>, vector<80x96xf32> -> vector<80x96xf32>
    %8 = vector.extract_strided_slice %7 {offsets = [0, 0], sizes = [16, 96], strides = [1, 1]} : vector<80x96xf32> to vector<16x96xf32>
    %9 = vector.extract_strided_slice %7 {offsets = [16, 0], sizes = [32, 96], strides = [1, 1]} : vector<80x96xf32> to vector<32x96xf32>
    %10 = vector.extract_strided_slice %7 {offsets = [48, 0], sizes = [32, 96], strides = [1, 1]} : vector<80x96xf32> to vector<32x96xf32>
    %11 = vector.extract_strided_slice %8 {offsets = [0, 0], sizes = [16, 8], strides = [1, 1]} : vector<16x96xf32> to vector<16x8xf32>
    %12 = vector.extract_strided_slice %8 {offsets = [0, 8], sizes = [16, 8], strides = [1, 1]} : vector<16x96xf32> to vector<16x8xf32>
    %13 = vector.extract_strided_slice %8 {offsets = [0, 16], sizes = [16, 8], strides = [1, 1]} : vector<16x96xf32> to vector<16x8xf32>
    %14 = vector.extract_strided_slice %8 {offsets = [0, 24], sizes = [16, 8], strides = [1, 1]} : vector<16x96xf32> to vector<16x8xf32>
    %15 = vector.extract_strided_slice %9 {offsets = [0, 32], sizes = [32, 8], strides = [1, 1]} : vector<32x96xf32> to vector<32x8xf32>
    %16 = vector.extract_strided_slice %9 {offsets = [0, 40], sizes = [32, 8], strides = [1, 1]} : vector<32x96xf32> to vector<32x8xf32>
    %17 = vector.extract_strided_slice %9 {offsets = [0, 48], sizes = [32, 8], strides = [1, 1]} : vector<32x96xf32> to vector<32x8xf32>
    %18 = vector.extract_strided_slice %9 {offsets = [0, 56], sizes = [32, 8], strides = [1, 1]} : vector<32x96xf32> to vector<32x8xf32>
    %19 = vector.extract_strided_slice %10 {offsets = [0, 64], sizes = [32, 8], strides = [1, 1]} : vector<32x96xf32> to vector<32x8xf32>
    %20 = vector.extract_strided_slice %10 {offsets = [0, 72], sizes = [32, 8], strides = [1, 1]} : vector<32x96xf32> to vector<32x8xf32>
    %21 = vector.extract_strided_slice %10 {offsets = [0, 80], sizes = [32, 8], strides = [1, 1]} : vector<32x96xf32> to vector<32x8xf32>
    %22 = vector.extract_strided_slice %10 {offsets = [0, 88], sizes = [32, 8], strides = [1, 1]} : vector<32x96xf32> to vector<32x8xf32>
    %23 = vector.extract_strided_slice %1 {offsets = [0, 0], sizes = [8, 32], strides = [1, 1]} : vector<32x32xf32> to vector<8x32xf32>
    %24 = vector.extract_strided_slice %1 {offsets = [8, 0], sizes = [8, 32], strides = [1, 1]} : vector<32x32xf32> to vector<8x32xf32>
    %25 = vector.extract_strided_slice %1 {offsets = [16, 0], sizes = [8, 32], strides = [1, 1]} : vector<32x32xf32> to vector<8x32xf32>
    %26 = vector.extract_strided_slice %1 {offsets = [24, 0], sizes = [8, 32], strides = [1, 1]} : vector<32x32xf32> to vector<8x32xf32>
    %c0_11 = arith.constant 0 : index
    %c0_12 = arith.constant 0 : index
    %c0_13 = arith.constant 0 : index
    %27 = vector.load %arg4[%c0_11, %c0_12, %c0_13] : memref<2x8x16xf32, #tpu.memory_space<vmem>>, vector<1x8x16xf32>
    %28 = vector.shape_cast %27 : vector<1x8x16xf32> to vector<8x16xf32>
    %29 = vector.extract_strided_slice %11 {offsets = [0, 0], sizes = [8, 8], strides = [1, 1]} : vector<16x8xf32> to vector<8x8xf32>
    %30 = vector.extract_strided_slice %15 {offsets = [0, 0], sizes = [16, 8], strides = [1, 1]} : vector<32x8xf32> to vector<16x8xf32>
    %31 = vector.extract_strided_slice %19 {offsets = [0, 0], sizes = [16, 8], strides = [1, 1]} : vector<32x8xf32> to vector<16x8xf32>
    %cst_14 = arith.constant dense<0.000000e+00> : vector<8x16xf32>
    %32 = tpu.matmul %29, %30, %cst_14 {dimension_numbers = #tpu.dot_dimension_numbers<[1], [1], [0], [0], [0, 0, 1, 0], [], []>} : vector<8x8xf32>, vector<16x8xf32>, vector<8x16xf32> -> vector<8x16xf32>
    %33 = arith.addf %32, %28 : vector<8x16xf32>
    %cst_15 = arith.constant dense<0xFF800000> : vector<8xf32>
    %34 = vector.multi_reduction <maximumf>, %33, %cst_15 [1] : vector<8x16xf32> to vector<8xf32>
    %35 = vector.shape_cast %34 : vector<8xf32> to vector<8x1xf32>
    %36 = vector.broadcast %35 : vector<8x1xf32> to vector<8x16xf32>
    %37 = arith.subf %33, %36 : vector<8x16xf32>
    %38 = math.exp %37 : vector<8x16xf32>
    %cst_16 = arith.constant dense<0.000000e+00> : vector<8xf32>
    %39 = vector.multi_reduction <add>, %38, %cst_16 [1] : vector<8x16xf32> to vector<8xf32>
    %40 = vector.shape_cast %39 : vector<8xf32> to vector<8x1xf32>
    %cst_17 = arith.constant dense<0.000000e+00> : vector<8x8xf32>
    %41 = tpu.matmul %38, %31, %cst_17 {dimension_numbers = #tpu.dot_dimension_numbers<[1], [0], [0], [1], [0, 0, 1, 1], [], []>} : vector<8x16xf32>, vector<16x8xf32>, vector<8x8xf32> -> vector<8x8xf32>
    %42 = tpu.reciprocal %40 {approx = true} : vector<8x1xf32> -> vector<8x1xf32>
    %43 = vector.broadcast %42 : vector<8x1xf32> to vector<8x8xf32>
    %44 = arith.mulf %41, %43 : vector<8x8xf32>
    %cst_18 = arith.constant dense<0.000000e+00> : vector<8x32xf32>
    %45 = tpu.matmul %44, %23, %cst_18 {dimension_numbers = #tpu.dot_dimension_numbers<[1], [0], [0], [1], [0, 0, 1, 1], [], []>} : vector<8x8xf32>, vector<8x32xf32>, vector<8x32xf32> -> vector<8x32xf32>
    %46 = vector.extract_strided_slice %12 {offsets = [0, 0], sizes = [8, 8], strides = [1, 1]} : vector<16x8xf32> to vector<8x8xf32>
    %47 = vector.extract_strided_slice %16 {offsets = [0, 0], sizes = [16, 8], strides = [1, 1]} : vector<32x8xf32> to vector<16x8xf32>
    %48 = vector.extract_strided_slice %20 {offsets = [0, 0], sizes = [16, 8], strides = [1, 1]} : vector<32x8xf32> to vector<16x8xf32>
    %cst_19 = arith.constant dense<0.000000e+00> : vector<8x16xf32>
    %49 = tpu.matmul %46, %47, %cst_19 {dimension_numbers = #tpu.dot_dimension_numbers<[1], [1], [0], [0], [0, 0, 1, 0], [], []>} : vector<8x8xf32>, vector<16x8xf32>, vector<8x16xf32> -> vector<8x16xf32>
    %50 = arith.addf %49, %28 : vector<8x16xf32>
    %cst_20 = arith.constant dense<0xFF800000> : vector<8xf32>
    %51 = vector.multi_reduction <maximumf>, %50, %cst_20 [1] : vector<8x16xf32> to vector<8xf32>
    %52 = vector.shape_cast %51 : vector<8xf32> to vector<8x1xf32>
    %53 = vector.broadcast %52 : vector<8x1xf32> to vector<8x16xf32>
    %54 = arith.subf %50, %53 : vector<8x16xf32>
    %55 = math.exp %54 : vector<8x16xf32>
    %cst_21 = arith.constant dense<0.000000e+00> : vector<8xf32>
    %56 = vector.multi_reduction <add>, %55, %cst_21 [1] : vector<8x16xf32> to vector<8xf32>
    %57 = vector.shape_cast %56 : vector<8xf32> to vector<8x1xf32>
    %cst_22 = arith.constant dense<0.000000e+00> : vector<8x8xf32>
    %58 = tpu.matmul %55, %48, %cst_22 {dimension_numbers = #tpu.dot_dimension_numbers<[1], [0], [0], [1], [0, 0, 1, 1], [], []>} : vector<8x16xf32>, vector<16x8xf32>, vector<8x8xf32> -> vector<8x8xf32>
    %59 = tpu.reciprocal %57 {approx = true} : vector<8x1xf32> -> vector<8x1xf32>
    %60 = vector.broadcast %59 : vector<8x1xf32> to vector<8x8xf32>
    %61 = arith.mulf %58, %60 : vector<8x8xf32>
    %cst_23 = arith.constant dense<0.000000e+00> : vector<8x32xf32>
    %62 = tpu.matmul %61, %24, %cst_23 {dimension_numbers = #tpu.dot_dimension_numbers<[1], [0], [0], [1], [0, 0, 1, 1], [], []>} : vector<8x8xf32>, vector<8x32xf32>, vector<8x32xf32> -> vector<8x32xf32>
    %63 = arith.addf %45, %62 : vector<8x32xf32>
    %64 = vector.extract_strided_slice %13 {offsets = [0, 0], sizes = [8, 8], strides = [1, 1]} : vector<16x8xf32> to vector<8x8xf32>
    %65 = vector.extract_strided_slice %17 {offsets = [0, 0], sizes = [16, 8], strides = [1, 1]} : vector<32x8xf32> to vector<16x8xf32>
    %66 = vector.extract_strided_slice %21 {offsets = [0, 0], sizes = [16, 8], strides = [1, 1]} : vector<32x8xf32> to vector<16x8xf32>
    %cst_24 = arith.constant dense<0.000000e+00> : vector<8x16xf32>
    %67 = tpu.matmul %64, %65, %cst_24 {dimension_numbers = #tpu.dot_dimension_numbers<[1], [1], [0], [0], [0, 0, 1, 0], [], []>} : vector<8x8xf32>, vector<16x8xf32>, vector<8x16xf32> -> vector<8x16xf32>
    %68 = arith.addf %67, %28 : vector<8x16xf32>
    %cst_25 = arith.constant dense<0xFF800000> : vector<8xf32>
    %69 = vector.multi_reduction <maximumf>, %68, %cst_25 [1] : vector<8x16xf32> to vector<8xf32>
    %70 = vector.shape_cast %69 : vector<8xf32> to vector<8x1xf32>
    %71 = vector.broadcast %70 : vector<8x1xf32> to vector<8x16xf32>
    %72 = arith.subf %68, %71 : vector<8x16xf32>
    %73 = math.exp %72 : vector<8x16xf32>
    %cst_26 = arith.constant dense<0.000000e+00> : vector<8xf32>
    %74 = vector.multi_reduction <add>, %73, %cst_26 [1] : vector<8x16xf32> to vector<8xf32>
    %75 = vector.shape_cast %74 : vector<8xf32> to vector<8x1xf32>
    %cst_27 = arith.constant dense<0.000000e+00> : vector<8x8xf32>
    %76 = tpu.matmul %73, %66, %cst_27 {dimension_numbers = #tpu.dot_dimension_numbers<[1], [0], [0], [1], [0, 0, 1, 1], [], []>} : vector<8x16xf32>, vector<16x8xf32>, vector<8x8xf32> -> vector<8x8xf32>
    %77 = tpu.reciprocal %75 {approx = true} : vector<8x1xf32> -> vector<8x1xf32>
    %78 = vector.broadcast %77 : vector<8x1xf32> to vector<8x8xf32>
    %79 = arith.mulf %76, %78 : vector<8x8xf32>
    %cst_28 = arith.constant dense<0.000000e+00> : vector<8x32xf32>
    %80 = tpu.matmul %79, %25, %cst_28 {dimension_numbers = #tpu.dot_dimension_numbers<[1], [0], [0], [1], [0, 0, 1, 1], [], []>} : vector<8x8xf32>, vector<8x32xf32>, vector<8x32xf32> -> vector<8x32xf32>
    %81 = arith.addf %63, %80 : vector<8x32xf32>
    %82 = vector.extract_strided_slice %14 {offsets = [0, 0], sizes = [8, 8], strides = [1, 1]} : vector<16x8xf32> to vector<8x8xf32>
    %83 = vector.extract_strided_slice %18 {offsets = [0, 0], sizes = [16, 8], strides = [1, 1]} : vector<32x8xf32> to vector<16x8xf32>
    %84 = vector.extract_strided_slice %22 {offsets = [0, 0], sizes = [16, 8], strides = [1, 1]} : vector<32x8xf32> to vector<16x8xf32>
    %cst_29 = arith.constant dense<0.000000e+00> : vector<8x16xf32>
    %85 = tpu.matmul %82, %83, %cst_29 {dimension_numbers = #tpu.dot_dimension_numbers<[1], [1], [0], [0], [0, 0, 1, 0], [], []>} : vector<8x8xf32>, vector<16x8xf32>, vector<8x16xf32> -> vector<8x16xf32>
    %86 = arith.addf %85, %28 : vector<8x16xf32>
    %cst_30 = arith.constant dense<0xFF800000> : vector<8xf32>
    %87 = vector.multi_reduction <maximumf>, %86, %cst_30 [1] : vector<8x16xf32> to vector<8xf32>
    %88 = vector.shape_cast %87 : vector<8xf32> to vector<8x1xf32>
    %89 = vector.broadcast %88 : vector<8x1xf32> to vector<8x16xf32>
    %90 = arith.subf %86, %89 : vector<8x16xf32>
    %91 = math.exp %90 : vector<8x16xf32>
    %cst_31 = arith.constant dense<0.000000e+00> : vector<8xf32>
    %92 = vector.multi_reduction <add>, %91, %cst_31 [1] : vector<8x16xf32> to vector<8xf32>
    %93 = vector.shape_cast %92 : vector<8xf32> to vector<8x1xf32>
    %cst_32 = arith.constant dense<0.000000e+00> : vector<8x8xf32>
    %94 = tpu.matmul %91, %84, %cst_32 {dimension_numbers = #tpu.dot_dimension_numbers<[1], [0], [0], [1], [0, 0, 1, 1], [], []>} : vector<8x16xf32>, vector<16x8xf32>, vector<8x8xf32> -> vector<8x8xf32>
    %95 = tpu.reciprocal %93 {approx = true} : vector<8x1xf32> -> vector<8x1xf32>
    %96 = vector.broadcast %95 : vector<8x1xf32> to vector<8x8xf32>
    %97 = arith.mulf %94, %96 : vector<8x8xf32>
    %cst_33 = arith.constant dense<0.000000e+00> : vector<8x32xf32>
    %98 = tpu.matmul %97, %26, %cst_33 {dimension_numbers = #tpu.dot_dimension_numbers<[1], [0], [0], [1], [0, 0, 1, 1], [], []>} : vector<8x8xf32>, vector<8x32xf32>, vector<8x32xf32> -> vector<8x32xf32>
    %99 = arith.addf %81, %98 : vector<8x32xf32>
    %100 = vector.broadcast %2 : vector<1x32xf32> to vector<8x32xf32>
    %101 = arith.addf %99, %100 : vector<8x32xf32>
    %c0_34 = arith.constant 0 : index
    %c0_35 = arith.constant 0 : index
    %102 = vector.load %arg8[%c0_34, %c0_35] : memref<16x32xf32, #tpu.memory_space<vmem>>, vector<8x32xf32>
    tpu.vector_store %arg8[%c0_34, %c0_35], %101 {strides = array<i32>} : memref<16x32xf32, #tpu.memory_space<vmem>>, vector<8x32xf32>,
    %c1 = arith.constant 1 : index
    %c0_36 = arith.constant 0 : index
    %c0_37 = arith.constant 0 : index
    %103 = vector.load %arg4[%c1, %c0_36, %c0_37] : memref<2x8x16xf32, #tpu.memory_space<vmem>>, vector<1x8x16xf32>
    %104 = vector.shape_cast %103 : vector<1x8x16xf32> to vector<8x16xf32>
    %105 = vector.extract_strided_slice %11 {offsets = [8, 0], sizes = [8, 8], strides = [1, 1]} : vector<16x8xf32> to vector<8x8xf32>
    %106 = vector.extract_strided_slice %15 {offsets = [16, 0], sizes = [16, 8], strides = [1, 1]} : vector<32x8xf32> to vector<16x8xf32>
    %107 = vector.extract_strided_slice %19 {offsets = [16, 0], sizes = [16, 8], strides = [1, 1]} : vector<32x8xf32> to vector<16x8xf32>
    %cst_38 = arith.constant dense<0.000000e+00> : vector<8x16xf32>
    %108 = tpu.matmul %105, %106, %cst_38 {dimension_numbers = #tpu.dot_dimension_numbers<[1], [1], [0], [0], [0, 0, 1, 0], [], []>} : vector<8x8xf32>, vector<16x8xf32>, vector<8x16xf32> -> vector<8x16xf32>
    %109 = arith.addf %108, %104 : vector<8x16xf32>
    %cst_39 = arith.constant dense<0xFF800000> : vector<8xf32>
    %110 = vector.multi_reduction <maximumf>, %109, %cst_39 [1] : vector<8x16xf32> to vector<8xf32>
    %111 = vector.shape_cast %110 : vector<8xf32> to vector<8x1xf32>
    %112 = vector.broadcast %111 : vector<8x1xf32> to vector<8x16xf32>
    %113 = arith.subf %109, %112 : vector<8x16xf32>
    %114 = math.exp %113 : vector<8x16xf32>
    %cst_40 = arith.constant dense<0.000000e+00> : vector<8xf32>
    %115 = vector.multi_reduction <add>, %114, %cst_40 [1] : vector<8x16xf32> to vector<8xf32>
    %116 = vector.shape_cast %115 : vector<8xf32> to vector<8x1xf32>
    %cst_41 = arith.constant dense<0.000000e+00> : vector<8x8xf32>
    %117 = tpu.matmul %114, %107, %cst_41 {dimension_numbers = #tpu.dot_dimension_numbers<[1], [0], [0], [1], [0, 0, 1, 1], [], []>} : vector<8x16xf32>, vector<16x8xf32>, vector<8x8xf32> -> vector<8x8xf32>
    %118 = tpu.reciprocal %116 {approx = true} : vector<8x1xf32> -> vector<8x1xf32>
    %119 = vector.broadcast %118 : vector<8x1xf32> to vector<8x8xf32>
    %120 = arith.mulf %117, %119 : vector<8x8xf32>
    %cst_42 = arith.constant dense<0.000000e+00> : vector<8x32xf32>
    %121 = tpu.matmul %120, %23, %cst_42 {dimension_numbers = #tpu.dot_dimension_numbers<[1], [0], [0], [1], [0, 0, 1, 1], [], []>} : vector<8x8xf32>, vector<8x32xf32>, vector<8x32xf32> -> vector<8x32xf32>
    %122 = vector.extract_strided_slice %12 {offsets = [8, 0], sizes = [8, 8], strides = [1, 1]} : vector<16x8xf32> to vector<8x8xf32>
    %123 = vector.extract_strided_slice %16 {offsets = [16, 0], sizes = [16, 8], strides = [1, 1]} : vector<32x8xf32> to vector<16x8xf32>
    %124 = vector.extract_strided_slice %20 {offsets = [16, 0], sizes = [16, 8], strides = [1, 1]} : vector<32x8xf32> to vector<16x8xf32>
    %cst_43 = arith.constant dense<0.000000e+00> : vector<8x16xf32>
    %125 = tpu.matmul %122, %123, %cst_43 {dimension_numbers = #tpu.dot_dimension_numbers<[1], [1], [0], [0], [0, 0, 1, 0], [], []>} : vector<8x8xf32>, vector<16x8xf32>, vector<8x16xf32> -> vector<8x16xf32>
    %126 = arith.addf %125, %104 : vector<8x16xf32>
    %cst_44 = arith.constant dense<0xFF800000> : vector<8xf32>
    %127 = vector.multi_reduction <maximumf>, %126, %cst_44 [1] : vector<8x16xf32> to vector<8xf32>
    %128 = vector.shape_cast %127 : vector<8xf32> to vector<8x1xf32>
    %129 = vector.broadcast %128 : vector<8x1xf32> to vector<8x16xf32>
    %130 = arith.subf %126, %129 : vector<8x16xf32>
    %131 = math.exp %130 : vector<8x16xf32>
    %cst_45 = arith.constant dense<0.000000e+00> : vector<8xf32>
    %132 = vector.multi_reduction <add>, %131, %cst_45 [1] : vector<8x16xf32> to vector<8xf32>
    %133 = vector.shape_cast %132 : vector<8xf32> to vector<8x1xf32>
    %cst_46 = arith.constant dense<0.000000e+00> : vector<8x8xf32>
    %134 = tpu.matmul %131, %124, %cst_46 {dimension_numbers = #tpu.dot_dimension_numbers<[1], [0], [0], [1], [0, 0, 1, 1], [], []>} : vector<8x16xf32>, vector<16x8xf32>, vector<8x8xf32> -> vector<8x8xf32>
    %135 = tpu.reciprocal %133 {approx = true} : vector<8x1xf32> -> vector<8x1xf32>
    %136 = vector.broadcast %135 : vector<8x1xf32> to vector<8x8xf32>
    %137 = arith.mulf %134, %136 : vector<8x8xf32>
    %cst_47 = arith.constant dense<0.000000e+00> : vector<8x32xf32>
    %138 = tpu.matmul %137, %24, %cst_47 {dimension_numbers = #tpu.dot_dimension_numbers<[1], [0], [0], [1], [0, 0, 1, 1], [], []>} : vector<8x8xf32>, vector<8x32xf32>, vector<8x32xf32> -> vector<8x32xf32>
    %139 = arith.addf %121, %138 : vector<8x32xf32>
    %140 = vector.extract_strided_slice %13 {offsets = [8, 0], sizes = [8, 8], strides = [1, 1]} : vector<16x8xf32> to vector<8x8xf32>
    %141 = vector.extract_strided_slice %17 {offsets = [16, 0], sizes = [16, 8], strides = [1, 1]} : vector<32x8xf32> to vector<16x8xf32>
    %142 = vector.extract_strided_slice %21 {offsets = [16, 0], sizes = [16, 8], strides = [1, 1]} : vector<32x8xf32> to vector<16x8xf32>
    %cst_48 = arith.constant dense<0.000000e+00> : vector<8x16xf32>
    %143 = tpu.matmul %140, %141, %cst_48 {dimension_numbers = #tpu.dot_dimension_numbers<[1], [1], [0], [0], [0, 0, 1, 0], [], []>} : vector<8x8xf32>, vector<16x8xf32>, vector<8x16xf32> -> vector<8x16xf32>
    %144 = arith.addf %143, %104 : vector<8x16xf32>
    %cst_49 = arith.constant dense<0xFF800000> : vector<8xf32>
    %145 = vector.multi_reduction <maximumf>, %144, %cst_49 [1] : vector<8x16xf32> to vector<8xf32>
    %146 = vector.shape_cast %145 : vector<8xf32> to vector<8x1xf32>
    %147 = vector.broadcast %146 : vector<8x1xf32> to vector<8x16xf32>
    %148 = arith.subf %144, %147 : vector<8x16xf32>
    %149 = math.exp %148 : vector<8x16xf32>
    %cst_50 = arith.constant dense<0.000000e+00> : vector<8xf32>
    %150 = vector.multi_reduction <add>, %149, %cst_50 [1] : vector<8x16xf32> to vector<8xf32>
    %151 = vector.shape_cast %150 : vector<8xf32> to vector<8x1xf32>
    %cst_51 = arith.constant dense<0.000000e+00> : vector<8x8xf32>
    %152 = tpu.matmul %149, %142, %cst_51 {dimension_numbers = #tpu.dot_dimension_numbers<[1], [0], [0], [1], [0, 0, 1, 1], [], []>} : vector<8x16xf32>, vector<16x8xf32>, vector<8x8xf32> -> vector<8x8xf32>
    %153 = tpu.reciprocal %151 {approx = true} : vector<8x1xf32> -> vector<8x1xf32>
    %154 = vector.broadcast %153 : vector<8x1xf32> to vector<8x8xf32>
    %155 = arith.mulf %152, %154 : vector<8x8xf32>
    %cst_52 = arith.constant dense<0.000000e+00> : vector<8x32xf32>
    %156 = tpu.matmul %155, %25, %cst_52 {dimension_numbers = #tpu.dot_dimension_numbers<[1], [0], [0], [1], [0, 0, 1, 1], [], []>} : vector<8x8xf32>, vector<8x32xf32>, vector<8x32xf32> -> vector<8x32xf32>
    %157 = arith.addf %139, %156 : vector<8x32xf32>
    %158 = vector.extract_strided_slice %14 {offsets = [8, 0], sizes = [8, 8], strides = [1, 1]} : vector<16x8xf32> to vector<8x8xf32>
    %159 = vector.extract_strided_slice %18 {offsets = [16, 0], sizes = [16, 8], strides = [1, 1]} : vector<32x8xf32> to vector<16x8xf32>
    %160 = vector.extract_strided_slice %22 {offsets = [16, 0], sizes = [16, 8], strides = [1, 1]} : vector<32x8xf32> to vector<16x8xf32>
    %cst_53 = arith.constant dense<0.000000e+00> : vector<8x16xf32>
    %161 = tpu.matmul %158, %159, %cst_53 {dimension_numbers = #tpu.dot_dimension_numbers<[1], [1], [0], [0], [0, 0, 1, 0], [], []>} : vector<8x8xf32>, vector<16x8xf32>, vector<8x16xf32> -> vector<8x16xf32>
    %162 = arith.addf %161, %104 : vector<8x16xf32>
    %cst_54 = arith.constant dense<0xFF800000> : vector<8xf32>
    %163 = vector.multi_reduction <maximumf>, %162, %cst_54 [1] : vector<8x16xf32> to vector<8xf32>
    %164 = vector.shape_cast %163 : vector<8xf32> to vector<8x1xf32>
    %165 = vector.broadcast %164 : vector<8x1xf32> to vector<8x16xf32>
    %166 = arith.subf %162, %165 : vector<8x16xf32>
    %167 = math.exp %166 : vector<8x16xf32>
    %cst_55 = arith.constant dense<0.000000e+00> : vector<8xf32>
    %168 = vector.multi_reduction <add>, %167, %cst_55 [1] : vector<8x16xf32> to vector<8xf32>
    %169 = vector.shape_cast %168 : vector<8xf32> to vector<8x1xf32>
    %cst_56 = arith.constant dense<0.000000e+00> : vector<8x8xf32>
    %170 = tpu.matmul %167, %160, %cst_56 {dimension_numbers = #tpu.dot_dimension_numbers<[1], [0], [0], [1], [0, 0, 1, 1], [], []>} : vector<8x16xf32>, vector<16x8xf32>, vector<8x8xf32> -> vector<8x8xf32>
    %171 = tpu.reciprocal %169 {approx = true} : vector<8x1xf32> -> vector<8x1xf32>
    %172 = vector.broadcast %171 : vector<8x1xf32> to vector<8x8xf32>
    %173 = arith.mulf %170, %172 : vector<8x8xf32>
    %cst_57 = arith.constant dense<0.000000e+00> : vector<8x32xf32>
    %174 = tpu.matmul %173, %26, %cst_57 {dimension_numbers = #tpu.dot_dimension_numbers<[1], [0], [0], [1], [0, 0, 1, 1], [], []>} : vector<8x8xf32>, vector<8x32xf32>, vector<8x32xf32> -> vector<8x32xf32>
    %175 = arith.addf %157, %174 : vector<8x32xf32>
    %176 = vector.broadcast %2 : vector<1x32xf32> to vector<8x32xf32>
    %177 = arith.addf %175, %176 : vector<8x32xf32>
    %c8 = arith.constant 8 : index
    %c0_58 = arith.constant 0 : index
    %178 = vector.load %arg8[%c8, %c0_58] : memref<16x32xf32, #tpu.memory_space<vmem>>, vector<8x32xf32>
    tpu.vector_store %arg8[%c8, %c0_58], %177 {strides = array<i32>} : memref<16x32xf32, #tpu.memory_space<vmem>>, vector<8x32xf32>,
    return
  }
  func.func @transform_0(%arg0: i32) -> (i32, i32) {
    %c0_i32 = arith.constant 0 : i32
    %c0_i32_0 = arith.constant 0 : i32
    return %arg0, %c0_i32 : i32, i32
  }
  func.func @transform_1(%arg0: i32) -> (i32, i32) {
    %c0_i32 = arith.constant 0 : i32
    %c0_i32_0 = arith.constant 0 : i32
    return %arg0, %c0_i32 : i32, i32
  }
  func.func @transform_2(%arg0: i32) -> (i32, i32) {
    %c0_i32 = arith.constant 0 : i32
    %c0_i32_0 = arith.constant 0 : i32
    return %arg0, %c0_i32 : i32, i32
  }
  func.func @transform_3(%arg0: i32) -> (i32, i32, i32) {
    %c0_i32 = arith.constant 0 : i32
    %c0_i32_0 = arith.constant 0 : i32
    %c0_i32_1 = arith.constant 0 : i32
    return %arg0, %c0_i32, %c0_i32_0 : i32, i32, i32
  }
  func.func @transform_4(%arg0: i32) -> (i32, i32) {
    %c0_i32 = arith.constant 0 : i32
    %c0_i32_0 = arith.constant 0 : i32
    %c0_i32_1 = arith.constant 0 : i32
    return %c0_i32, %c0_i32_0 : i32, i32
  }
  func.func @transform_5(%arg0: i32) -> (i32, i32) {
    %c0_i32 = arith.constant 0 : i32
    %c0_i32_0 = arith.constant 0 : i32
    %c0_i32_1 = arith.constant 0 : i32
    return %c0_i32, %c0_i32_0 : i32, i32
  }
  func.func @transform_6(%arg0: i32) -> (i32, i32) {
    %c0_i32 = arith.constant 0 : i32
    %c0_i32_0 = arith.constant 0 : i32
    %c0_i32_1 = arith.constant 0 : i32
    return %c0_i32, %c0_i32_0 : i32, i32
  }
  func.func @transform_7(%arg0: i32) -> (i32, i32) {
    %c0_i32 = arith.constant 0 : i32
    %c0_i32_0 = arith.constant 0 : i32
    return %arg0, %c0_i32 : i32, i32
  }
}

</mosaic_0001>

<bundles_post_ra>
// kernel: tpu_custom_call.1
= control target key start
LH: loop header
LB: loop body
LE: loop exit
PB: predicated region body
PF: predicated region fallthrough
CT: control target
= control target key end

     0   :  { %12 = vsyncpa [#allocation3], 0  ;;  %s3415_s0 = inlined_call_operand.hbm [shape: f32[16,32], index: 0, kind: input, shape index: {}]   ;;  %s3416_s1 = inlined_call_operand.hbm [shape: f32[32,32], index: 1, kind: input, shape index: {}]   ;;  %s3417_s2 = inlined_call_operand.hbm [shape: f32[32,32], index: 2, kind: input, shape index: {}]   ;;  %s3418_s3 = inlined_call_operand.hbm [shape: f32[2,8,16], index: 3, kind: input, shape index: {}]   ;;  %s3419_s4 = inlined_call_operand.hbm [shape: f32[32,96], index: 4, kind: input, shape index: {}]   ;;  %s3420_s5 = inlined_call_operand.hbm [shape: f32[32,32], index: 5, kind: input, shape index: {}]   ;;  %s3421_s6 = inlined_call_operand.hbm [shape: f32[1,32], index: 6, kind: input, shape index: {}]   ;;  %s3422_s7 = inlined_call_operand.hbm [shape: f32[16,32], index: 7, kind: output, shape index: {}]  }
   0x1   :  { %13 = vsyncpa [#allocation6], 0 }
   0x2   :  { %14 = vsyncpa [#allocation9], 0 }
   0x3   :  { %15 = vsyncpa [#allocation12], 0 }
   0x4   :  { %16 = vsyncpa [#allocation4], 0  ;;  %s2980_s24 = smov [#allocation5]   ;;  %s2981_s26 = smov [#allocation8]  }
   0x5   :  { %s34_s25 = sshll.u32 %s2980_s24, 4  ;;  %s58_s27 = sshll.u32 %s2981_s26, 4  ;;  %s35_s25 = int_to_ptr.vmem [resolvable:$true] %s34_s25  ;;  %s3044_s27 = int_to_ptr.vmem [resolvable:$true] %s58_s27 }
   0x6   :  { %s2794_s30 = scalar_lea.hbm %s3416_s1, 512 }
   0x7   :  { %p2795_p0 = scmp.ne.s32.totalorder %s3416_s1, %s2794_s30  ;;  %p2798_p1 = scmp.lt.u32.totalorder %s2794_s30, %s3416_s1 }
   0x9   :  { %p2800_p2 = pnand %p2798_p1, %p2795_p0 }
   0xb   :  { %2803 = shalt.err (!%p2800_p2)
}
   0xc   :  { %s2804_s12 = scalar_lea.vmem %s35_s25, 512  ;;  %p2809_p4 = scmp.lt.s32.totalorder %s35_s25, %s35_s25 }
   0xd   :  { %p2805_p3 = scmp.ne.s32.totalorder %s35_s25, %s2804_s12  ;;  %p2810_p5 = scmp.lt.s32.totalorder %s2804_s12, %s2804_s12 }
   0xf   :  { %p2811_p6 = por %p2810_p5, %p2809_p4 }
  0x11   :  { %p2812_p7 = pnand %p2811_p6, %p2805_p3 }
  0x13   :  { %2815 = shalt.err (!%p2812_p7)
}
  0x14   :  { %s2982_s13 = smov 128   ;;  %s2983_s14 = smov 8  }
  0x15   :  { %40 = dma.hbm_to_vmem [thread:$0]  %s3416_s1, 512, %s35_s25, [#allocation6], %s2982_s13, %s2982_s13, %s2983_s14  }
  0x16   :  { %s2816_s19 = scalar_lea.hbm %s3418_s3, 256 }
  0x17   :  { %p2817_p8 = scmp.ne.s32.totalorder %s3418_s3, %s2816_s19  ;;  %p2820_p9 = scmp.lt.u32.totalorder %s2816_s19, %s3418_s3 }
  0x19   :  { %p2822_p10 = pnand %p2820_p9, %p2817_p8 }
  0x1b   :  { %2825 = shalt.err (!%p2822_p10)
}
  0x1c   :  { %s2826_s24 = scalar_lea.vmem %s3044_s27, 256  ;;  %p2831_p12 = scmp.lt.s32.totalorder %s3044_s27, %s3044_s27 }
  0x1d   :  { %p2827_p11 = scmp.ne.s32.totalorder %s3044_s27, %s2826_s24  ;;  %p2832_p13 = scmp.lt.s32.totalorder %s2826_s24, %s2826_s24 }
  0x1f   :  { %p2833_p0 = por %p2832_p13, %p2831_p12 }
  0x21   :  { %p2834_p1 = pnand %p2833_p0, %p2827_p11 }
  0x23   :  { %2837 = shalt.err (!%p2834_p1)
}
  0x24   :  { %64 = dma.hbm_to_vmem [thread:$0]  %s3418_s3, 256, %s3044_s27, [#allocation9], %s2982_s13, %s2982_s13, %s2983_s14  }
  0x25   :  { %s2984_s26 = smov [#allocation11]   ;;  %s2985_s29 = smov [#allocation2]  }
  0x26   :  { %s82_s28 = sshll.u32 %s2984_s26, 4  ;;  %s22_s30 = sshll.u32 %s2985_s29, 4  ;;  %s83_s28 = int_to_ptr.vmem [resolvable:$true] %s82_s28  ;;  %s3081_s30 = int_to_ptr.vmem [resolvable:$true] %s22_s30 }
  0x27   :  { %s2838_s10 = scalar_lea.hbm %s3420_s5, 512 }
  0x28   :  { %p2839_p2 = scmp.ne.s32.totalorder %s3420_s5, %s2838_s10  ;;  %p2842_p3 = scmp.lt.u32.totalorder %s2838_s10, %s3420_s5 }
  0x2a   :  { %p2844_p4 = pnand %p2842_p3, %p2839_p2 }
  0x2c   :  { %2847 = shalt.err (!%p2844_p4)
}
  0x2d   :  { %s2848_s3 = scalar_lea.vmem %s83_s28, 512  ;;  %p2853_p6 = scmp.lt.s32.totalorder %s83_s28, %s83_s28 }
  0x2e   :  { %p2849_p5 = scmp.ne.s32.totalorder %s83_s28, %s2848_s3  ;;  %p2854_p7 = scmp.lt.s32.totalorder %s2848_s3, %s2848_s3 }
  0x30   :  { %p2855_p8 = por %p2854_p7, %p2853_p6 }
  0x32   :  { %p2856_p9 = pnand %p2855_p8, %p2849_p5 }
  0x34   :  { %2859 = shalt.err (!%p2856_p9)
}
  0x35   :  { %88 = dma.hbm_to_vmem [thread:$0]  %s3420_s5, 512, %s83_s28, [#allocation12], %s2982_s13, %s2982_s13, %s2983_s14  }
  0x36   :  { %s2860_s20 = scalar_lea.hbm %s3415_s0, 256 }
  0x37   :  { %p2861_p10 = scmp.ne.s32.totalorder %s3415_s0, %s2860_s20  ;;  %p2864_p11 = scmp.lt.u32.totalorder %s2860_s20, %s3415_s0 }
  0x39   :  { %p2866_p12 = pnand %p2864_p11, %p2861_p10 }
  0x3b   :  { %2869 = shalt.err (!%p2866_p12)
}
  0x3c   :  { %s2870_s1 = scalar_lea.vmem %s3081_s30, 256  ;;  %p2875_p0 = scmp.lt.s32.totalorder %s3081_s30, %s3081_s30 }
  0x3d   :  { %p2871_p13 = scmp.ne.s32.totalorder %s3081_s30, %s2870_s1  ;;  %p2876_p1 = scmp.lt.s32.totalorder %s2870_s1, %s2870_s1 }
  0x3f   :  { %p2877_p2 = por %p2876_p1, %p2875_p0 }
  0x41   :  { %p2878_p3 = pnand %p2877_p2, %p2871_p13 }
  0x43   :  { %2881 = shalt.err (!%p2878_p3)
}
  0x44   :  { %28 = dma.hbm_to_vmem [thread:$0]  %s3415_s0, 256, %s3081_s30, [#allocation3], %s2982_s13, %s2982_s13, %s2983_s14  }
  0x45   :  { %s2986_s26 = smov [#allocation7]   ;;  %s2987_s29 = smov [#allocation10]  }
  0x46   :  { %s46_s28 = sshll.u32 %s2986_s26, 4  ;;  %s70_s8 = sshll.u32 %s2987_s29, 4  ;;  %s47_s28 = int_to_ptr.vmem [resolvable:$true] %s46_s28  ;;  %s3118_s8 = int_to_ptr.vmem [resolvable:$true] %s70_s8 }
  0x47   :  { %s2882_s11 = scalar_lea.hbm %s3417_s2, 512 }
  0x48   :  { %p2883_p4 = scmp.ne.s32.totalorder %s3417_s2, %s2882_s11  ;;  %p2886_p5 = scmp.lt.u32.totalorder %s2882_s11, %s3417_s2 }
  0x4a   :  { %p2888_p6 = pnand %p2886_p5, %p2883_p4 }
  0x4c   :  { %2891 = shalt.err (!%p2888_p6)
}
  0x4d   :  { %s2892_s0 = scalar_lea.vmem %s47_s28, 512  ;;  %p2897_p8 = scmp.lt.s32.totalorder %s47_s28, %s47_s28 }
  0x4e   :  { %p2893_p7 = scmp.ne.s32.totalorder %s47_s28, %s2892_s0  ;;  %p2898_p9 = scmp.lt.s32.totalorder %s2892_s0, %s2892_s0 }
  0x50   :  { %p2899_p10 = por %p2898_p9, %p2897_p8 }
  0x52   :  { %p2900_p11 = pnand %p2899_p10, %p2893_p7 }
  0x54   :  { %2903 = shalt.err (!%p2900_p11)
}
  0x55   :  { %52 = dma.hbm_to_vmem [thread:$0]  %s3417_s2, 512, %s47_s28, [#allocation6], %s2982_s13, %s2982_s13, %s2983_s14  }
  0x56   :  { %s2904_s19 = scalar_lea.hbm %s3419_s4, 512 }
  0x57   :  { %p2905_p12 = scmp.ne.s32.totalorder %s3419_s4, %s2904_s19  ;;  %p2908_p13 = scmp.lt.u32.totalorder %s2904_s19, %s3419_s4 }
  0x59   :  { %p2910_p0 = pnand %p2908_p13, %p2905_p12 }
  0x5b   :  { %2913 = shalt.err (!%p2910_p0)
}
  0x5c   :  { %s2914_s24 = scalar_lea.vmem %s3118_s8, 512  ;;  %p2919_p2 = scmp.lt.s32.totalorder %s3118_s8, %s3118_s8 }
  0x5d   :  { %p2915_p1 = scmp.ne.s32.totalorder %s3118_s8, %s2914_s24  ;;  %p2920_p3 = scmp.lt.s32.totalorder %s2914_s24, %s2914_s24 }
  0x5f   :  { %p2921_p4 = por %p2920_p3, %p2919_p2 }
  0x61   :  { %p2922_p5 = pnand %p2921_p4, %p2915_p1 }
  0x63   :  { %2925 = shalt.err (!%p2922_p5)
}
  0x64   :  { %76 = dma.hbm_to_vmem [thread:$0]  %s3419_s4, 512, %s3118_s8, [#allocation9], %s2982_s13, %s2982_s13, %s2983_s14  }
  0x65   :  { %s2988_s5 = smov [#allocation13]   ;;  %s2926_s29 = scalar_lea.hbm %s3421_s6, 16 }
  0x66   :  { %s95_s25 = sshll.u32 %s2988_s5, 4  ;;  %p2927_p6 = scmp.ne.s32.totalorder %s3421_s6, %s2926_s29  ;;  %s96_s25 = int_to_ptr.vmem [resolvable:$true] %s95_s25 }
  0x67   :  { %p2930_p7 = scmp.lt.u32.totalorder %s2926_s29, %s3421_s6 }
  0x69   :  { %p2932_p8 = pnand %p2930_p7, %p2927_p6 }
  0x6b   :  { %2935 = shalt.err (!%p2932_p8)
}
  0x6c   :  { %s2936_s15 = scalar_lea.vmem %s96_s25, 16  ;;  %s2940_s4 = scalar_lea.vmem %s96_s25, 32 }
  0x6d   :  { %p2937_p9 = scmp.ne.s32.totalorder %s96_s25, %s2936_s15  ;;  %p2941_p10 = scmp.lt.s32.totalorder %s96_s25, %s96_s25 }
  0x6e   :  { %p2942_p11 = scmp.lt.s32.totalorder %s2940_s4, %s2936_s15 }
  0x70   :  { %p2943_p12 = por %p2942_p11, %p2941_p10 }
  0x72   :  { %p2944_p13 = pnand %p2943_p12, %p2937_p9 }
  0x74   :  { %2947 = shalt.err (!%p2944_p13)
}
  0x75   :  { %98 = dma.hbm_to_vmem [thread:$0]  %s3421_s6, 16, %s96_s25, [#allocation12]  }
  0x76   :  { %2970 = dma.done.wait [#allocation3], 256  }
  0x77   :  { %2971 = vsyncadd [#allocation3], 4294967040 }
  0x78   :  { %2972 = dma.done.wait [#allocation6], 1024  }
  0x79   :  { %2973 = vsyncadd [#allocation6], 4294966272 }
  0x7a   :  { %2974 = dma.done.wait [#allocation9], 768  }
  0x7b   :  { %2975 = vsyncadd [#allocation9], 4294966528 }
  0x7c   :  { %2976 = dma.done.wait [#allocation12], 528  }
  0x7d   :  { %2977 = vsyncadd [#allocation12], 4294966768  ;;  %vm139_vm0 = vcmask 261120   ;;  %v120_v0 = vld [vmem:[#allocation10] sm:$0xff]  ;;  %v121_v1 = vld [vmem:[#allocation10 + $0x8] sm:$0xff]  ;;  %v2989_v14 = vmov 0.0|0.0  }
  0x7e   :  { %v122_v2 = vld [vmem:[#allocation10 + $0x10] sm:$0xff]  ;;  %v2594_v3 = vpack.c.bf16 %v121_v1, %v120_v0  ;;  %v123_v4 = vld [vmem:[#allocation10 + $0x18] sm:$0xff]  ;;  %v129_v5 = vld [vmem:[#allocation2] sm:$0xff]  ;;  %2602 = vmatprep.subr.bf16.mxu1 %v2989_v14  ;;  %vm2990_vm1 = vmmov 0   ;;  %v2991_v19 = vmov 0.0   ;;  %s2992_s6 = smov 96  }
  0x7f   :  { %v2598_v6 = vpack.c.bf16 %v123_v4, %v122_v2  ;;  %2427 = vmatprep.mubr.msk.f32.mxu0 %vm139_vm0, %v129_v5  ;;  %v130_v7 = vld [vmem:[#allocation2 + $0x8] sm:$0xff]  ;;  %v131_v8 = vld [vmem:[#allocation5] sm:$0xff]  ;;  %v132_v9 = vld [vmem:[#allocation5 + $0x8] sm:$0xff]  ;;  %2446 = vmatprep.mubr.msk.f32.mxu1 %vm2990_vm1, %v2991_v19  ;;  %s2993_s3 = smov 64   ;;  %s2994_s0 = smov 88   ;;  %vm292_vm2 = vcmask 64512  }
  0x80   :  { %2595 = vmatprep.subr.bf16.mxu0 %v2594_v3  ;;  %v133_v10 = vld [vmem:[#allocation5 + $0x10] sm:$0xff]  ;;  %v134_v11 = vld [vmem:[#allocation5 + $0x18] sm:$0xff]  ;;  %v135_v12 = vld [vmem:[#allocation7] sm:$0xff]  ;;  %s2995_s30 = smov 120   ;;  %vm370_vm4 = vcmask 130048   ;;  %s2996_s27 = smov 56  }
  0x81   :  { %2597 = vmatpush3.bf16.msra.mxu0 %v2594_v3  ;;  %v136_v13 = vld [vmem:[#allocation7 + $0x8] sm:$0xff]  ;;  %vm3194_vm3 = vmpackc.low %vm292_vm2, %vm292_vm2  ;;  %v3207_v36 = vld [vmem:[#allocation8] sm:$0xff]  ;;  %s2997_s17 = smov 112   ;;  %s2998_s18 = smov 72  }
  0x82   :  { %2599 = vmatprep.subr.bf16.mxu0 %v2598_v6  ;;  %s2999_s19 = smov 104   ;;  %s3000_s20 = smov 48   ;;  %v3232_v5 = vld [vmem:[#allocation11] sm:$0xff] }
  0x83   :  { %s3001_s21 = smov 80   ;;  %s3002_s22 = smov 40  }
  0x84   :  { %s3003_s23 = smov [#allocation14]  }
  0x85   :  { %2601 = vmatpush3.bf16.msra.mxu0 %v2598_v6  ;;  %s2275_s24 = sshll.u32 %s3003_s23, 4  ;;  %s2276_s24 = int_to_ptr.vmem [resolvable:$true] %s2275_s24 }
  0x86   :  { %2470 = vmatprep.subr.mxu0 %v2991_v19  ;;  %s2948_s2 = scalar_lea.vmem %s2276_s24, 256  ;;  %p2953_p1 = scmp.lt.s32.totalorder %s2276_s24, %s2276_s24 }
  0x87   :  { %p2949_p0 = scmp.ne.s32.totalorder %s2276_s24, %s2948_s2  ;;  %p2954_p2 = scmp.lt.s32.totalorder %s2948_s2, %s2948_s2 }
  0x88   :  { %2428 = vmatmul.mubr.msk.f32.vlgmr.msra.gmra.mrb[0].mxu0 %vm139_vm0, %v130_v7 }
  0x89   :  { %2430 = vmatprep.mubr.msk.f32.mxu0 %vm139_vm0, %v131_v8  ;;  %p2955_p3 = por %p2954_p2, %p2953_p1 }
  0x8b   :  { %p2956_p4 = pnand %p2955_p3, %p2949_p0 }
  0x8c   :  { %2431 = vmatmul.mubr.msk.f32.gmra.mrb[2].mxu0 %vm139_vm0, %v132_v9 }
  0x8d   :  { %2433 = vmatprep.mubr.msk.f32.mxu0 %vm139_vm0, %v133_v10 }
  0x90   :  { %2434 = vmatmul.mubr.msk.f32.gmra.mrb[4].mxu0 %vm139_vm0, %v134_v11 }
  0x91   :  { %2436 = vmatprep.mubr.msk.f32.mxu0 %vm139_vm0, %v135_v12 }
  0x94   :  { %2437 = vmatmul.mubr.msk.f32.gmra.mrb[6].mxu0 %vm139_vm0, %v136_v13  ;;  %v3246_v13 = vld [vmem:[#allocation11 + $0x8] sm:$0xff] }
  0x95   :  { %2471 = vmatpush3.msra.mxu0 %v3246_v13 }
  0x96   :  { %2616 = vmatprep.subr.bf16.mxu0 %v2989_v14 }
 0x15b   :  { %v3176_v15 = vpop.f32.mrb[0].mxu0 }
 0x15c   :  { %v236_v16 = vpop.f32.mrb[1].mxu0 }
 0x15f   :  { %v2432_v17 = vpop.f32.mrb[2].mxu0 }
 0x160   :  { %v246_v18 = vpop.f32.mrb[3].mxu0 }
 0x161   :  { %v3181_v20 = vpack.i.bf16 %v2432_v17, %v246_v18  ;;  %v138_v17 = vld [vmem:[#allocation7 + $0x18] sm:$0xff] }
 0x163   :  { %2683 = vrot.lane.b32.xlu0 %v3181_v20, %s2992_s6  ;;  %v2435_v21 = vpop.f32.mrb[4].mxu0 }
 0x164   :  { %v256_v22 = vpop.f32.mrb[5].mxu0 }
 0x165   :  { %v3205_v35 = vpack.i.bf16 %v2435_v21, %v256_v22 }
 0x167   :  { %v2438_v23 = vpop.f32.mrb[6].mxu0 }
 0x168   :  { %v266_v24 = vpop.f32.mrb[7].mxu0 }
 0x169   :  { %v3185_v25 = vpack.i.bf16 %v2438_v23, %v266_v24 }
 0x16b   :  { %2688 = vrot.lane.b32.xlu1 %v3185_v25, %s2993_s3 }
 0x16f   :  { %2693 = vrot.lane.b32.xlu1 %v3181_v20, %s2994_s0 }
 0x173   :  { %463 = vrot.lane.b32.xlu1 %v236_v16, %s2995_s30 }
 0x1d5   :  { %v2684_v26 = vpop.permute.xlu0 %2683 }
 0x1d6   :  { %v2686_v27 = vunpack.i.h.bf16 %v2684_v26  ;;  %v2685_v28 = vunpack.i.l.bf16 %v2684_v26 }
 0x1d8   :  { %v2603_v30 = vpack.c.bf16 %v2686_v27, %v2685_v28 }
 0x1da   :  { %2605 = vmatpush3.bf16.xpose.msk.msra.mxu1 %vm3194_vm3, %v2603_v30 }
 0x1db   :  { %2606 = vmatprep.subr.bf16.mxu1 %v2989_v14 }
 0x1dd   :  { %v2689_v31 = vpop.permute.xlu1 %2688 }
 0x1de   :  { %v2691_v32 = vunpack.i.h.bf16 %v2689_v31  ;;  %v2690_v33 = vunpack.i.l.bf16 %v2689_v31 }
 0x1e0   :  { %v2607_v34 = vpack.c.bf16 %v2691_v32, %v2690_v33 }
 0x1e1   :  { %2447 = vmatmul.mubr.msk.f32.vlgmr.msra.gmra.mrb[0].mxu1 %vm292_vm2, %v236_v16  ;;  %v2694_v44 = vpop.permute.xlu1 %2693 }
 0x1e2   :  { %2608 = vmatpush3.bf16.msra.mxu1 %v2607_v34  ;;  %2453 = vmatprep.mubr.msk.f32.mxu1 %vm2990_vm1, %v2991_v19  ;;  %v2696_v45 = vunpack.i.h.bf16 %v2694_v44  ;;  %v2695_v46 = vunpack.i.l.bf16 %v2694_v44 }
 0x1e3   :  { %2609 = vmatprep.subr.bf16.mxu1 %v2989_v14 }
 0x1e4   :  { %v2610_v48 = vpack.c.bf16 %v2696_v45, %v2695_v46 }
 0x1e5   :  { %v464_v53 = vpop.permute.xlu1 %463 }
 0x2b4   :  { %v366_v37 = vpop.f32.mrb[0].mxu1 }
 0x2b5   :  { %v367_v38 = vadd.f32 %v366_v37, %v3207_v36  ;;  %v2448_v39 = vpop.f32.mrb[1].mxu1 }
 0x2b7   :  { %v371_v40 = vsel %vm370_vm4, %v367_v38, -inf }
 0x2b8   :  { %372 = vmax.xlane.f32.xlu0 %v371_v40 }
 0x2ce   :  { %2698 = vrot.lane.b32.xlu0 %v3185_v25, %s2996_s27 }
 0x2d2   :  { %781 = vrot.lane.b32.xlu0 %v236_v16, %s2997_s17 }
 0x2d6   :  { %2708 = vrot.lane.b32.xlu0 %v3181_v20, %s2998_s18 }
 0x2da   :  { %1027 = vrot.lane.b32.xlu0 %v236_v16, %s2999_s19  ;;  %v137_v16 = vld [vmem:[#allocation7 + $0x10] sm:$0xff] }
 0x2db   :  { %2439 = vmatprep.mubr.msk.f32.mxu0 %vm139_vm0, %v137_v16 }
 0x2dc   :  { %2440 = vmatmul.mubr.msk.f32.gmra.mrb[8].mxu0 %vm139_vm0, %v138_v17 }
 0x2dd   :  { %2472 = vmatprep.mubr.msk.f32.mxu0 %vm2990_vm1, %v2991_v19 }
 0x345   :  { %v373_v41 = vpop.xlane.xlu0 %372 }
 0x346   :  { %v374_v42 = vsub.f32 %v367_v38, %v373_v41 }
 0x348   :  { %v375_v43 = vmul.f32 1.442695, %v374_v42 }
 0x349   :  { %v2699_v49 = vpop.permute.xlu0 %2698 }
 0x34a   :  { %2762 = vpow2.f32 %v375_v43  ;;  %v2701_v51 = vunpack.i.h.bf16 %v2699_v49  ;;  %v2700_v52 = vunpack.i.l.bf16 %v2699_v49 }
 0x34c   :  { %v2614_v54 = vpack.c.bf16 %v2701_v51, %v2700_v52 }
 0x34d   :  { %v782_v61 = vpop.permute.xlu0 %781 }
 0x351   :  { %v2709_v62 = vpop.permute.xlu0 %2708 }
 0x352   :  { %v2711_v32 = vunpack.i.h.bf16 %v2709_v62  ;;  %v2710_v33 = vunpack.i.l.bf16 %v2709_v62 }
 0x354   :  { %v2763_v47 = vpop.eup %2762  ;;  %v2624_v34 = vpack.c.bf16 %v2711_v32, %v2710_v33 }
 0x355   :  { %2454 = vmatmul.mubr.msk.f32.vlgmr.msra.gmra.mrb[2].mxu1 %vm370_vm4, %v2763_v47  ;;  %v377_v50 = vsel %vm370_vm4, %v2763_v47, 0.0  ;;  %v1028_v63 = vpop.permute.xlu0 %1027 }
 0x356   :  { %2612 = vmatpush3.bf16.xpose.msk.msra.mxu1 %vm3194_vm3, %v2610_v48  ;;  %378 = vadd.xlane.f32.xlu0 %v377_v50 }
 0x357   :  { %2460 = vmatprep.mubr.msk.f32.mxu1 %vm2990_vm1, %v2991_v19  ;;  %2613 = vmatprep.subr.bf16.mxu1 %v2989_v14 }
 0x35d   :  { %2461 = vmatmul.mubr.msk.f32.vlgmr.msra.gmra.mrb[4].mxu1 %vm292_vm2, %v464_v53 }
 0x35e   :  { %2615 = vmatpush3.bf16.msra.mxu1 %v2614_v54  ;;  %2467 = vmatprep.mubr.msk.f32.mxu1 %vm2990_vm1, %v2991_v19 }
 0x35f   :  { %2475 = vmatprep.subr.mxu1 %v2991_v19 }
 0x36c   :  { %2713 = vrot.lane.b32.xlu0 %v3185_v25, %s3000_s20 }
 0x3af   :  { %v2441_v37 = vpop.f32.mrb[8].mxu0 }
 0x3b0   :  { %v276_v38 = vpop.f32.mrb[9].mxu0 }
 0x3b1   :  { %v3269_v39 = vpack.i.bf16 %v2441_v37, %v276_v38 }
 0x3e3   :  { %v379_v3 = vpop.xlane.xlu0 %378 }
 0x3e7   :  { %v2714_v4 = vpop.permute.xlu0 %2713 }
 0x3e8   :  { %v2716_v7 = vunpack.i.h.bf16 %v2714_v4  ;;  %v2715_v8 = vunpack.i.l.bf16 %v2714_v4 }
 0x3ea   :  { %v2621_v12 = vpack.c.bf16 %v2716_v7, %v2715_v8 }
 0x428   :  { %v457_v55 = vpop.f32.mrb[2].mxu1 }
 0x429   :  { %v2455_v56 = vpop.f32.mrb[3].mxu1 }
 0x430   :  { %v541_v57 = vpop.f32.mrb[4].mxu1 }
 0x431   :  { %v542_v58 = vadd.f32 %v541_v57, %v3207_v36  ;;  %v2462_v59 = vpop.f32.mrb[5].mxu1 }
 0x432   :  { %v3292_v59 = vld [vmem:[#allocation11 + $0x10] sm:$0xff] }
 0x433   :  { %v545_v60 = vsel %vm370_vm4, %v542_v58, -inf }
 0x434   :  { %546 = vmax.xlane.f32.xlu1 %v545_v60 }
 0x4c1   :  { %v547_v0 = vpop.xlane.xlu1 %546 }
 0x4c2   :  { %v548_v1 = vsub.f32 %v542_v58, %v547_v0 }
 0x4c4   :  { %v549_v2 = vmul.f32 1.442695, %v548_v1 }
 0x4c6   :  { %2764 = vpow2.f32 %v549_v2  ;;  %v3300_v2 = vld [vmem:[#allocation8 + $0x8] sm:$0xff] }
 0x4c7   :  { %2766 = vrcp.f32 %v379_v3 }
 0x4d0   :  { %v2765_v6 = vpop.eup %2764 }
 0x4d1   :  { %2468 = vmatmul.mubr.msk.f32.vlgmr.msra.gmra.mrb[6].mxu1 %vm370_vm4, %v2765_v6  ;;  %v551_v9 = vsel %vm370_vm4, %v2765_v6, 0.0  ;;  %v2767_v10 = vpop.eup %2766 }
 0x4d2   :  { %552 = vadd.xlane.f32.xlu1 %v551_v9  ;;  %2476 = vmatpush3.msra.mxu1 %v3232_v5  ;;  %v462_v11 = vmul.f32 %v2767_v10, %v457_v55 }
 0x4d3   :  { %2477 = vmatprep.mubr.msk.f32.mxu1 %vm2990_vm1, %v2991_v19  ;;  %2620 = vmatprep.subr.bf16.mxu1 %v2989_v14 }
 0x4d5   :  { %2478 = vmatmul.mubr.msk.f32.vlgmr.msra.gmra.mrb[8].mxu1 %vm292_vm2, %v462_v11 }
 0x4d6   :  { %2622 = vmatpush3.bf16.msra.mxu1 %v2621_v12  ;;  %2491 = vmatprep.mubr.msk.f32.mxu1 %vm2990_vm1, %v2991_v19 }
 0x4d7   :  { %2494 = vmatprep.subr.mxu1 %v2991_v19 }
 0x4e3   :  { %2703 = vrot.lane.b32.xlu1 %v3181_v20, %s3001_s21 }
 0x55f   :  { %v553_v18 = vpop.xlane.xlu1 %552 }
 0x560   :  { %2768 = vrcp.f32 %v553_v18  ;;  %v3316_v18 = vld [vmem:[#allocation11 + $0x18] sm:$0xff] }
 0x563   :  { %v2704_v21 = vpop.permute.xlu1 %2703 }
 0x564   :  { %v2706_v22 = vunpack.i.h.bf16 %v2704_v21  ;;  %v2705_v20 = vunpack.i.l.bf16 %v2704_v21 }
 0x566   :  { %v2617_v28 = vpack.c.bf16 %v2706_v22, %v2705_v20 }
 0x56a   :  { %v2769_v23 = vpop.eup %2768 }
 0x5a4   :  { %v629_v24 = vpop.f32.mrb[6].mxu1 }
 0x5a5   :  { %v634_v26 = vmul.f32 %v2769_v23, %v629_v24  ;;  %v2469_v27 = vpop.f32.mrb[7].mxu1 }
 0x5a7   :  { %2473 = vmatmul.mubr.msk.f32.vlgmr.msra.gmra.mrb[10].mxu0 %vm292_vm2, %v634_v26 }
 0x5a8   :  { %2619 = vmatpush3.bf16.xpose.msk.msra.mxu0 %vm3194_vm3, %v2617_v28  ;;  %v777_v30 = vpop.f32.mrb[8].mxu1  ;;  %2484 = vmatprep.mubr.msk.f32.mxu0 %vm2990_vm1, %v2991_v19 }
 0x5a9   :  { %v2479_v31 = vpop.f32.mrb[9].mxu1  ;;  %2623 = vmatprep.subr.bf16.mxu0 %v2989_v14 }
 0x5af   :  { %2485 = vmatmul.mubr.msk.f32.vlgmr.msra.gmra.mrb[12].mxu0 %vm292_vm2, %v782_v61 }
 0x5b0   :  { %2626 = vmatpush3.bf16.xpose.msk.msra.mxu0 %vm3194_vm3, %v2624_v34  ;;  %2503 = vmatprep.mubr.msk.f32.mxu0 %vm2990_vm1, %v2991_v19 }
 0x5b1   :  { %2630 = vmatprep.subr.bf16.mxu0 %v2989_v14 }
 0x5b7   :  { %2504 = vmatmul.mubr.msk.f32.vlgmr.msra.gmra.mrb[14].mxu0 %vm292_vm2, %v1028_v63 }
 0x5b8   :  { %2522 = vmatprep.mubr.msk.f32.mxu0 %vm2990_vm1, %v2991_v19 }
 0x67a   :  { %v704_v40 = vpop.f32.mrb[10].mxu0 }
 0x67b   :  { %v3271_v41 = vadd.f32 %v777_v30, %v704_v40  ;;  %v2474_v42 = vpop.f32.mrb[11].mxu0 }
 0x682   :  { %v859_v43 = vpop.f32.mrb[12].mxu0 }
 0x683   :  { %v860_v44 = vadd.f32 %v859_v43, %v3207_v36  ;;  %v2486_v45 = vpop.f32.mrb[13].mxu0 }
 0x685   :  { %v863_v46 = vsel %vm370_vm4, %v860_v44, -inf }
 0x686   :  { %864 = vmax.xlane.f32.xlu1 %v863_v46 }
 0x68a   :  { %v1105_v47 = vpop.f32.mrb[14].mxu0 }
 0x68b   :  { %v2505_v48 = vpop.f32.mrb[15].mxu0  ;;  %v1106_v49 = vadd.f32 %v1105_v47, %v3207_v36 }
 0x68d   :  { %v1109_v50 = vsel %vm370_vm4, %v1106_v49, -inf }
 0x697   :  { %2718 = vrot.lane.b32.xlu1 %v3205_v35, %s2992_s6 }
 0x6bb   :  { %1110 = vmax.xlane.f32.xlu1 %v1109_v50  ;;  %v3337_v50 = vld [vmem:[#allocation13] ss:$0 sm:$0xff] }
 0x713   :  { %v865_v51 = vpop.xlane.xlu1 %864 }
 0x714   :  { %v866_v52 = vsub.f32 %v860_v44, %v865_v51 }
 0x716   :  { %v867_v53 = vmul.f32 1.442695, %v866_v52 }
 0x717   :  { %v2719_v54 = vpop.permute.xlu1 %2718 }
 0x718   :  { %2770 = vpow2.f32 %v867_v53  ;;  %v2721_v55 = vunpack.i.h.bf16 %v2719_v54  ;;  %v2720_v56 = vunpack.i.l.bf16 %v2719_v54 }
 0x71a   :  { %v2631_v57 = vpack.c.bf16 %v2721_v55, %v2720_v56 }
 0x71c   :  { %2633 = vmatpush3.bf16.xpose.msk.msra.mxu0 %vm3194_vm3, %v2631_v57 }
 0x71d   :  { %2641 = vmatprep.subr.bf16.mxu0 %v2989_v14 }
 0x722   :  { %v2771_v58 = vpop.eup %2770 }
 0x723   :  { %2492 = vmatmul.mubr.msk.f32.vlgmr.msra.gmra.mrb[10].mxu1 %vm370_vm4, %v2771_v58  ;;  %2523 = vmatmul.mubr.msk.f32.vlgmr.msra.gmra.mrb[16].mxu0 %vm292_vm2, %v3176_v15  ;;  %v869_v36 = vsel %vm370_vm4, %v2771_v58, 0.0 }
 0x724   :  { %870 = vadd.xlane.f32.xlu0 %v869_v36  ;;  %2496 = vmatprep.mubr.msk.f32.mxu1 %vm2990_vm1, %v2991_v19 }
 0x725   :  { %2543 = vmatprep.mubr.msk.f32.mxu0 %vm2990_vm1, %v2991_v19  ;;  %2495 = vmatpush3.msra.mxu1 %v3292_v59 }
 0x726   :  { %2627 = vmatprep.subr.bf16.mxu1 %v2989_v14 }
 0x73a   :  { %2723 = vrot.lane.b32.xlu0 %v3185_v25, %s3002_s22 }
 0x73e   :  { %2733 = vrot.lane.b32.xlu0 %v3205_v35, %s2994_s0 }
 0x742   :  { %1458 = vrot.lane.b32.xlu0 %v3176_v15, %s2995_s30 }
 0x748   :  { %v1111_v60 = vpop.xlane.xlu1 %1110 }
 0x749   :  { %v1112_v61 = vsub.f32 %v1106_v49, %v1111_v60 }
 0x74b   :  { %v1113_v63 = vmul.f32 1.442695, %v1112_v61 }
 0x7b1   :  { %v871_v62 = vpop.xlane.xlu0 %870 }
 0x7b2   :  { %2772 = vrcp.f32 %v871_v62 }
 0x7b3   :  { %2774 = vpow2.f32 %v1113_v63 }
 0x7b5   :  { %v2724_v0 = vpop.permute.xlu0 %2723 }
 0x7b6   :  { %v2726_v25 = vunpack.i.h.bf16 %v2724_v0  ;;  %v2725_v1 = vunpack.i.l.bf16 %v2724_v0 }
 0x7b8   :  { %v2628_v11 = vpack.c.bf16 %v2726_v25, %v2725_v1 }
 0x7b9   :  { %v2734_v45 = vpop.permute.xlu0 %2733 }
 0x7ba   :  { %v2736_v47 = vunpack.i.h.bf16 %v2734_v45 }
 0x7bc   :  { %v2773_v3 = vpop.eup %2772 }
 0x7bd   :  { %v2775_v16 = vpop.eup %2774  ;;  %v1459_v49 = vpop.permute.xlu0 %1458 }
 0x7be   :  { %v1115_v17 = vsel %vm370_vm4, %v2775_v16, 0.0 }
 0x7f6   :  { %v947_v4 = vpop.f32.mrb[10].mxu1  ;;  %v1362_v6 = vpop.f32.mrb[16].mxu0 }
 0x7f7   :  { %v952_v7 = vmul.f32 %v2773_v3, %v947_v4  ;;  %v1363_v8 = vadd.f32 %v1362_v6, %v3300_v2  ;;  %v2493_v9 = vpop.f32.mrb[11].mxu1  ;;  %v2524_v10 = vpop.f32.mrb[17].mxu0 }
 0x7f9   :  { %2497 = vmatmul.mubr.msk.f32.vlgmr.msra.gmra.mrb[12].mxu1 %vm292_vm2, %v952_v7  ;;  %v1366_v12 = vsel %vm370_vm4, %v1363_v8, -inf }
 0x7fa   :  { %2629 = vmatpush3.bf16.msra.mxu1 %v2628_v11  ;;  %1367 = vmax.xlane.f32.xlu1 %v1366_v12 }
 0x7fb   :  { %2510 = vmatprep.mubr.msk.f32.mxu1 %vm2990_vm1, %v2991_v19  ;;  %2513 = vmatprep.subr.mxu1 %v2991_v19 }
 0x7fd   :  { %2511 = vmatmul.mubr.msk.f32.vlgmr.msra.gmra.mrb[14].mxu1 %vm370_vm4, %v2775_v16 }
 0x7fe   :  { %1116 = vadd.xlane.f32.xlu1 %v1115_v17  ;;  %2515 = vmatprep.mubr.msk.f32.mxu1 %vm2990_vm1, %v2991_v19 }
 0x7ff   :  { %2514 = vmatpush3.msra.mxu1 %v3316_v18 }
 0x800   :  { %2634 = vmatprep.subr.bf16.mxu1 %v2989_v14 }
 0x80f   :  { %2728 = vrot.lane.b32.xlu1 %v3269_v39, %s2993_s3 }
 0x813   :  { %2738 = vrot.lane.b32.xlu1 %v3269_v39, %s2996_s27 }
 0x887   :  { %v1368_v21 = vpop.xlane.xlu1 %1367 }
 0x888   :  { %v1369_v28 = vsub.f32 %v1363_v8, %v1368_v21 }
 0x88a   :  { %v1370_v30 = vmul.f32 1.442695, %v1369_v28 }
 0x88b   :  { %v1117_v22 = vpop.xlane.xlu1 %1116 }
 0x88c   :  { %2776 = vrcp.f32 %v1117_v22 }
 0x88d   :  { %2778 = vpow2.f32 %v1370_v30 }
 0x88f   :  { %v2729_v20 = vpop.permute.xlu1 %2728 }
 0x890   :  { %v2731_v34 = vunpack.i.h.bf16 %v2729_v20  ;;  %v2730_v37 = vunpack.i.l.bf16 %v2729_v20 }
 0x892   :  { %v2635_v44 = vpack.c.bf16 %v2731_v34, %v2730_v37 }
 0x893   :  { %v2739_v23 = vpop.permute.xlu1 %2738 }
 0x894   :  { %v2741_v24 = vunpack.i.h.bf16 %v2739_v23  ;;  %v2740_v26 = vunpack.i.l.bf16 %v2739_v23 }
 0x896   :  { %v2642_v27 = vpack.c.bf16 %v2741_v24, %v2740_v26  ;;  %v2777_v38 = vpop.eup %2776 }
 0x897   :  { %v2779_v46 = vpop.eup %2778 }
 0x898   :  { %2643 = vmatpush3.bf16.msra.mxu0 %v2642_v27 }
 0x899   :  { %2546 = vmatprep.subr.mxu0 %v2991_v19 }
 0x8cc   :  { %v1022_v31 = vpop.f32.mrb[12].mxu1 }
 0x8cd   :  { %v1026_v32 = vadd.f32 %v1022_v31, %v3271_v41  ;;  %v2498_v33 = vpop.f32.mrb[13].mxu1  ;;  %v2735_v41 = vunpack.i.l.bf16 %v2734_v45 }
 0x8cf   :  { %v2638_v48 = vpack.c.bf16 %v2736_v47, %v2735_v41 }
 0x8d0   :  { %v1193_v40 = vpop.f32.mrb[14].mxu1 }
 0x8d1   :  { %v1198_v42 = vmul.f32 %v2777_v38, %v1193_v40  ;;  %v2512_v43 = vpop.f32.mrb[15].mxu1 }
 0x8d3   :  { %2516 = vmatmul.mubr.msk.f32.vlgmr.msra.gmra.mrb[16].mxu1 %vm292_vm2, %v1198_v42 }
 0x8d4   :  { %2636 = vmatpush3.bf16.msra.mxu1 %v2635_v44  ;;  %2529 = vmatprep.mubr.msk.f32.mxu1 %vm2990_vm1, %v2991_v19 }
 0x8d5   :  { %2637 = vmatprep.subr.bf16.mxu1 %v2989_v14 }
 0x8d7   :  { %2530 = vmatmul.mubr.msk.f32.vlgmr.msra.gmra.mrb[18].mxu1 %vm370_vm4, %v2779_v46 }
 0x8d8   :  { %2536 = vmatprep.mubr.msk.f32.mxu1 %vm2990_vm1, %v2991_v19 }
 0x8dd   :  { %2640 = vmatpush3.bf16.xpose.msk.msra.mxu1 %vm3194_vm3, %v2638_v48 }
 0x8de   :  { %2551 = vmatprep.subr.mxu1 %v2991_v19 }
 0x8e4   :  { %2537 = vmatmul.mubr.msk.f32.vlgmr.msra.gmra.mrb[20].mxu1 %vm292_vm2, %v1459_v49 }
 0x8e5   :  { %2552 = vmatpush3.msra.mxu1 %v3232_v5  ;;  %2553 = vmatprep.mubr.msk.f32.mxu1 %vm2990_vm1, %v2991_v19 }
 0x8e6   :  { %2648 = vmatprep.subr.bf16.mxu1 %v2989_v14 }
 0x9a6   :  { %v1268_v51 = vpop.f32.mrb[16].mxu1 }
 0x9a7   :  { %v1272_v52 = vadd.f32 %v1268_v51, %v1026_v32  ;;  %v2517_v53 = vpop.f32.mrb[17].mxu1 }
 0x9a9   :  { %v1279_v54 = vadd.f32 %v3337_v50, %v1272_v52 }
 0x9aa   :  { %v1452_v55 = vpop.f32.mrb[18].mxu1 }
 0x9ab   :  { %1280 = vst.msk [vmem:[#allocation14] sm:$0xff] %vm139_vm0, %v1279_v54  ;;  %v2531_v56 = vpop.f32.mrb[19].mxu1 }
 0x9b7   :  { %v1536_v57 = vpop.f32.mrb[20].mxu1 }
 0x9b8   :  { %v1537_v58 = vadd.f32 %v1536_v57, %v3300_v2  ;;  %v2538_v5 = vpop.f32.mrb[21].mxu1 }
 0x9ba   :  { %v1540_v36 = vsel %vm370_vm4, %v1537_v58, -inf }
 0x9bb   :  { %1541 = vmax.xlane.f32.xlu0 %v1540_v36 }
 0x9d1   :  { %2743 = vrot.lane.b32.xlu0 %v3205_v35, %s3001_s21 }
 0x9d5   :  { %2748 = vrot.lane.b32.xlu0 %v3205_v35, %s2998_s18  ;;  %v1372_v35 = vsel %vm370_vm4, %v2779_v46, 0.0 }
 0x9d9   :  { %2022 = vrot.lane.b32.xlu0 %v3176_v15, %s2999_s19 }
 0xa48   :  { %v1542_v60 = vpop.xlane.xlu0 %1541 }
 0xa49   :  { %v1543_v61 = vsub.f32 %v1537_v58, %v1542_v60 }
 0xa4b   :  { %v1544_v62 = vmul.f32 1.442695, %v1543_v61 }
 0xa4c   :  { %v2744_v6 = vpop.permute.xlu0 %2743 }
 0xa4d   :  { %2780 = vpow2.f32 %v1544_v62  ;;  %v2745_v8 = vunpack.i.l.bf16 %v2744_v6 }
 0xa50   :  { %v2749_v16 = vpop.permute.xlu0 %2748 }
 0xa51   :  { %v2751_v17 = vunpack.i.h.bf16 %v2749_v16  ;;  %v2750_v21 = vunpack.i.l.bf16 %v2749_v16 }
 0xa53   :  { %v2652_v22 = vpack.c.bf16 %v2751_v17, %v2750_v21 }
 0xa54   :  { %v2023_v20 = vpop.permute.xlu0 %2022 }
 0xa57   :  { %v2781_v63 = vpop.eup %2780 }
 0xa58   :  { %2544 = vmatmul.mubr.msk.f32.vlgmr.msra.gmra.mrb[18].mxu0 %vm370_vm4, %v2781_v63  ;;  %v1546_v0 = vsel %vm370_vm4, %v2781_v63, 0.0 }
 0xa59   :  { %1547 = vadd.xlane.f32.xlu1 %v1546_v0  ;;  %2547 = vmatpush3.msra.mxu0 %v3246_v13  ;;  %v2746_v13 = vunpack.i.h.bf16 %v2744_v6 }
 0xa5a   :  { %2548 = vmatprep.mubr.msk.f32.mxu0 %vm2990_vm1, %v2991_v19  ;;  %2644 = vmatprep.subr.bf16.mxu0 %v2989_v14 }
 0xa5b   :  { %v2645_v12 = vpack.c.bf16 %v2746_v13, %v2745_v8 }
 0xa6a   :  { %1776 = vrot.lane.b32.xlu1 %v3176_v15, %s2997_s17 }
 0xa8e   :  { %1373 = vadd.xlane.f32.xlu1 %v1372_v35 }
 0xae6   :  { %v1548_v25 = vpop.xlane.xlu1 %1547 }
 0xaea   :  { %v1777_v1 = vpop.permute.xlu1 %1776 }
 0xb1b   :  { %v1374_v3 = vpop.xlane.xlu1 %1373 }
 0xb1c   :  { %2782 = vrcp.f32 %v1374_v3 }
 0xb1d   :  { %2784 = vrcp.f32 %v1548_v25 }
 0xb26   :  { %v2783_v4 = vpop.eup %2782 }
 0xb27   :  { %v1457_v7 = vmul.f32 %v2783_v4, %v1452_v55  ;;  %v2785_v9 = vpop.eup %2784 }
 0xb29   :  { %2554 = vmatmul.mubr.msk.f32.vlgmr.msra.gmra.mrb[22].mxu1 %vm292_vm2, %v1457_v7 }
 0xb2a   :  { %2567 = vmatprep.mubr.msk.f32.mxu1 %vm2990_vm1, %v2991_v19 }
 0xb2b   :  { %v1624_v15 = vpop.f32.mrb[18].mxu0 }
 0xb2c   :  { %v1629_v10 = vmul.f32 %v2785_v9, %v1624_v15  ;;  %v2545_v11 = vpop.f32.mrb[19].mxu0 }
 0xb2e   :  { %2549 = vmatmul.mubr.msk.f32.vlgmr.msra.gmra.mrb[20].mxu0 %vm292_vm2, %v1629_v10 }
 0xb2f   :  { %2647 = vmatpush3.bf16.xpose.msk.msra.mxu0 %vm3194_vm3, %v2645_v12  ;;  %2560 = vmatprep.mubr.msk.f32.mxu0 %vm2990_vm1, %v2991_v19 }
 0xb30   :  { %2651 = vmatprep.subr.bf16.mxu0 %v2989_v14 }
 0xb36   :  { %2561 = vmatmul.mubr.msk.f32.vlgmr.msra.gmra.mrb[22].mxu0 %vm292_vm2, %v1777_v1 }
 0xb37   :  { %2654 = vmatpush3.bf16.xpose.msk.msra.mxu0 %vm3194_vm3, %v2652_v22  ;;  %2579 = vmatprep.mubr.msk.f32.mxu0 %vm2990_vm1, %v2991_v19 }
 0xb3e   :  { %2580 = vmatmul.mubr.msk.f32.vlgmr.msra.gmra.mrb[24].mxu0 %vm292_vm2, %v2023_v20 }
 0xbfc   :  { %v1772_v23 = vpop.f32.mrb[22].mxu1 }
 0xbfd   :  { %v2555_v24 = vpop.f32.mrb[23].mxu1 }
 0xc01   :  { %v1699_v26 = vpop.f32.mrb[20].mxu0 }
 0xc02   :  { %v1773_v27 = vadd.f32 %v1772_v23, %v1699_v26  ;;  %v2550_v28 = vpop.f32.mrb[21].mxu0 }
 0xc09   :  { %v1854_v30 = vpop.f32.mrb[22].mxu0 }
 0xc0a   :  { %v1855_v31 = vadd.f32 %v1854_v30, %v3300_v2  ;;  %v2562_v32 = vpop.f32.mrb[23].mxu0 }
 0xc0c   :  { %v1858_v33 = vsel %vm370_vm4, %v1855_v31, -inf }
 0xc0d   :  { %1859 = vmax.xlane.f32.xlu0 %v1858_v33 }
 0xc11   :  { %v2100_v29 = vpop.f32.mrb[24].mxu0 }
 0xc12   :  { %v2101_v34 = vadd.f32 %v2100_v29, %v3300_v2  ;;  %v2581_v37 = vpop.f32.mrb[25].mxu0 }
 0xc14   :  { %v2104_v38 = vsel %vm370_vm4, %v2101_v34, -inf }
 0xc15   :  { %2105 = vmax.xlane.f32.xlu1 %v2104_v38 }
 0xc23   :  { %2753 = vrot.lane.b32.xlu0 %v3269_v39, %s3000_s20 }
 0xc9a   :  { %v1860_v40 = vpop.xlane.xlu0 %1859 }
 0xc9b   :  { %v1861_v42 = vsub.f32 %v1855_v31, %v1860_v40 }
 0xc9d   :  { %v1862_v43 = vmul.f32 1.442695, %v1861_v42 }
 0xc9e   :  { %v2754_v44 = vpop.permute.xlu0 %2753 }
 0xc9f   :  { %2786 = vpow2.f32 %v1862_v43  ;;  %v2756_v45 = vunpack.i.h.bf16 %v2754_v44  ;;  %v2755_v46 = vunpack.i.l.bf16 %v2754_v44 }
 0xca1   :  { %v2649_v47 = vpack.c.bf16 %v2756_v45, %v2755_v46 }
 0xca2   :  { %v2106_v41 = vpop.xlane.xlu1 %2105 }
 0xca3   :  { %v2107_v48 = vsub.f32 %v2101_v34, %v2106_v41  ;;  %2650 = vmatpush3.bf16.msra.mxu1 %v2649_v47 }
 0xca4   :  { %2570 = vmatprep.subr.mxu1 %v2991_v19 }
 0xca5   :  { %v2108_v2 = vmul.f32 1.442695, %v2107_v48 }
 0xca7   :  { %2788 = vpow2.f32 %v2108_v2 }
 0xca9   :  { %v2787_v49 = vpop.eup %2786 }
 0xcaa   :  { %2568 = vmatmul.mubr.msk.f32.vlgmr.msra.gmra.mrb[24].mxu1 %vm370_vm4, %v2787_v49  ;;  %v1864_v51 = vsel %vm370_vm4, %v2787_v49, 0.0 }
 0xcab   :  { %1865 = vadd.xlane.f32.xlu1 %v1864_v51  ;;  %2571 = vmatpush3.msra.mxu1 %v3292_v59 }
 0xcac   :  { %2572 = vmatprep.mubr.msk.f32.mxu1 %vm2990_vm1, %v2991_v19  ;;  %2655 = vmatprep.subr.bf16.mxu1 %v2989_v14 }
 0xcb1   :  { %v2789_v52 = vpop.eup %2788 }
 0xcb2   :  { %v2110_v53 = vsel %vm370_vm4, %v2789_v52, 0.0 }
 0xcb3   :  { %2111 = vadd.xlane.f32.xlu0 %v2110_v53 }
 0xcbc   :  { %2758 = vrot.lane.b32.xlu1 %v3269_v39, %s3002_s22 }
 0xd38   :  { %v1866_v54 = vpop.xlane.xlu1 %1865 }
 0xd39   :  { %2790 = vrcp.f32 %v1866_v54 }
 0xd3c   :  { %v2759_v55 = vpop.permute.xlu1 %2758 }
 0xd3d   :  { %v2761_v56 = vunpack.i.h.bf16 %v2759_v55  ;;  %v2760_v57 = vunpack.i.l.bf16 %v2759_v55 }
 0xd3f   :  { %v2656_v60 = vpack.c.bf16 %v2761_v56, %v2760_v57 }
 0xd40   :  { %v2112_v14 = vpop.xlane.xlu0 %2111 }
 0xd41   :  { %2792 = vrcp.f32 %v2112_v14 }
 0xd43   :  { %v2791_v58 = vpop.eup %2790 }
 0xd4b   :  { %v2793_v63 = vpop.eup %2792 }
 0xd7d   :  { %v1942_v5 = vpop.f32.mrb[24].mxu1 }
 0xd7e   :  { %v1947_v59 = vmul.f32 %v2791_v58, %v1942_v5  ;;  %v2569_v36 = vpop.f32.mrb[25].mxu1 }
 0xd80   :  { %2573 = vmatmul.mubr.msk.f32.vlgmr.msra.gmra.mrb[26].mxu1 %vm292_vm2, %v1947_v59 }
 0xd81   :  { %2657 = vmatpush3.bf16.msra.mxu1 %v2656_v60  ;;  %2586 = vmatprep.mubr.msk.f32.mxu1 %vm2990_vm1, %v2991_v19 }
 0xd82   :  { %2589 = vmatprep.subr.mxu1 %v2991_v19 }
 0xd84   :  { %2587 = vmatmul.mubr.msk.f32.vlgmr.msra.gmra.mrb[28].mxu1 %vm370_vm4, %v2789_v52 }
 0xd85   :  { %2590 = vmatpush3.msra.mxu1 %v3316_v18  ;;  %2591 = vmatprep.mubr.msk.f32.mxu1 %vm2990_vm1, %v2991_v19 }
 0xe53   :  { %v2017_v39 = vpop.f32.mrb[26].mxu1 }
 0xe54   :  { %v2021_v61 = vadd.f32 %v2017_v39, %v1773_v27  ;;  %v2574_v62 = vpop.f32.mrb[27].mxu1 }
 0xe57   :  { %v2188_v0 = vpop.f32.mrb[28].mxu1 }
 0xe58   :  { %v2193_v35 = vmul.f32 %v2793_v63, %v2188_v0  ;;  %v2588_v25 = vpop.f32.mrb[29].mxu1 }
 0xe5a   :  { %2592 = vmatmul.mubr.msk.f32.vlgmr.msra.gmra.mrb[30].mxu1 %vm292_vm2, %v2193_v35 }
 0xf2d   :  { %v2263_v1 = vpop.f32.mrb[30].mxu1 }
 0xf2e   :  { %v2267_v3 = vadd.f32 %v2263_v1, %v2021_v61  ;;  %v2593_v4 = vpop.f32.mrb[31].mxu1 }
 0xf30   :  { %v2268_v18 = vadd.f32 %v3337_v50, %v2267_v3 }
 0xf32   :  { %2269 = vst.msk [vmem:[#allocation14 + $0x8] sm:$0xff] %vm139_vm0, %v2268_v18 }
 0xf33   :  { %2959 = shalt.err (!%p2956_p4)
}
 0xf34   :  { %s2960_s25 = scalar_lea.hbm %s3422_s7, 256 }
 0xf35   :  { %p2961_p5 = scmp.ne.s32.totalorder %s3422_s7, %s2960_s25  ;;  %p2964_p6 = scmp.lt.u32.totalorder %s2960_s25, %s3422_s7 }
 0xf37   :  { %p2966_p7 = pnand %p2964_p6, %p2961_p5 }
 0xf39   :  { %2969 = shalt.err (!%p2966_p7)
}
 0xf3a   :  { %2281 = dma.vmem_to_hbm [thread:$0]  %s2276_s24, 256, %s3422_s7, [#allocation4], %s2982_s13, %s2982_s13, %s2983_s14  }
 0xf3b   :  { %2978 = dma.done.wait [#allocation4], 256  }
 0xf3c   :  { %2979 = vsyncadd [#allocation4], 4294967040 }
 0xf3d   :  { %2285 = vsyncpa [#allocation3], 1 }
 0xf3e   :  { %2286 = vsyncpa [#allocation6], 1 }
 0xf3f   :  { %2287 = vsyncpa [#allocation9], 1 }
 0xf40   :  { %2288 = vsyncpa [#allocation12], 1 }
 0xf41   :  { %2289 = vsyncpa [#allocation4], 1 }

</bundles_post_ra>
